<compile_context>
chip_gen: v6e
topology: v6e:2x2x1
jax: 0.10.0
libtpu: 0.0.40
codegen_flags: <defaults>
</compile_context>

<pallas_src>
import jax
import jax.numpy as jnp
from jax.experimental import pallas as pl
from jax.experimental.pallas import tpu as pltpu

# ---- static problem sizes implied by the module -----------------------------
N = 2                         # batch
H = 8                         # conv "height" rows
W_IN = 1091                   # input width  -> conv out 1032 -> pool out 172
KW = 60                       # Conv2d kernel_size=(1, 60)
POOL = 6                      # MaxPool2d((1, 6), stride=(1, 6))
W_CONV = W_IN - KW + 1        # 1032
W_POOL = W_CONV // POOL       # 172
FLAT = H * W_POOL             # 1376  (matches x.view(-1, 1376))
HID = 173                     # Linear(1376, 173)
OUT = 14                      # Linear(173, 14)

WIN = KW + POOL               # 66: one window per pooled position covers all 6 offsets
FLAT_PAD = 1536               # 1376 -> 12*128 so FLAT can be chunked on the grid
NC = 2                        # dense1-K (FLAT) chunks
FC = FLAT_PAD // NC           # 768 (multiple of 128 -> lane-aligned blocks)


def net_kernel(cols_ref, wsh_ref, bc_ref, w1_ref, b1_ref, w2_ref, b2_ref,
               o_ref, h_acc, pool_s):
    """One grid step = one FLAT chunk of size FC (K-reduction of dense1).

    cols_ref : (N, WIN, FC) bf16  windows; window taps on sublanes, FLAT on lanes
    wsh_ref  : (POOL, WIN)  bf16  shifted conv taps (row j = pool offset j)
    bc_ref   : (1,) f32 SMEM      conv bias
    w1_ref   : (FC, HID)    bf16  dense_layer weight rows for this chunk
    b1_ref   : (1, HID) f32;  w2_ref: (HID, OUT) f32;  b2_ref: (1, OUT) f32
    o_ref    : (N, OUT) f32       resident output block (written on last chunk)
    h_acc    : (N, HID) f32 VMEM  dense1 pre-activation accumulator
    pool_s   : (N, FC)  f32 VMEM  staging for the pooled rows of this chunk
    """
    i = pl.program_id(0)
    nb = cols_ref.shape[0]

    @pl.when(i == 0)
    def _init():
        h_acc[...] = jnp.zeros_like(h_acc)

    wsh = wsh_ref[...]                                     # (POOL, WIN) bf16

    for b in range(nb):                                    # batch is tiny (2): unroll
        # conv for all 6 pool offsets at once on the MXU: (POOL,WIN)@(WIN,FC)
        s = jnp.dot(wsh, cols_ref[b], preferred_element_type=jnp.float32)
        pool_s[pl.ds(b, 1), :] = jnp.max(s, axis=0, keepdims=True)   # maxpool (1,6)/6

    # conv bias after the pool + relu (== relu-then-pool: bc constant over the
    # window, relu monotone); one (N, FC) VPU op per chunk, hoisted out of loop.
    pooled = jnp.maximum(pool_s[...] + bc_ref[0], 0.0)
    # single M=2 dense_layer partial matmul for this FLAT chunk (bf16 x bf16 -> f32)
    h_acc[...] += jnp.dot(pooled.astype(jnp.bfloat16), w1_ref[...],
                          preferred_element_type=jnp.float32)

    @pl.when(i == pl.num_programs(0) - 1)
    def _finalize():
        h = jnp.maximum(h_acc[...] + b1_ref[...], 0.0)     # F.relu(dense_layer)
        o_ref[...] = (jnp.dot(h, w2_ref[...], preferred_element_type=jnp.float32)
                      + b2_ref[...])                       # output layer


def pack_params(params):
    """One-time (per-model) weight prep: shifted conv-tap matrix, FLAT padding,
    bf16 casts for the two big matmul operands (amortized across calls)."""
    wc, bc, w1, b1, w2, b2 = params
    # wsh[j, m] = wc[m - j] for 0 <= m - j < KW, else 0.  Row j of (wsh @ window)
    # is then the conv output at pool offset j.  Column WIN-1 is all zero, so the
    # single zero-padded input column never contributes.
    j = jnp.arange(POOL)[:, None]
    m = jnp.arange(WIN)[None, :]
    k = m - j
    wsh = jnp.where((k >= 0) & (k < KW), wc[jnp.clip(k, 0, KW - 1)], 0.0)

    # Zero-padded rows [FLAT, FLAT_PAD) remain exactly zero through the bf16
    # cast, so the relu(bc) values in the padded lanes never leak into h_acc.
    w1p = jnp.zeros((FLAT_PAD, HID), jnp.float32).at[:FLAT, :].set(w1)
    return (wsh.astype(jnp.bfloat16),
            bc.reshape(1).astype(jnp.float32),
            w1p.astype(jnp.bfloat16),
            b1.reshape(1, HID).astype(jnp.float32),
            w2.astype(jnp.float32),
            b2.reshape(1, OUT).astype(jnp.float32))


def net_forward(x, packed):
    """x: (N, 1, H, W_IN) float32, NCHW exactly like the PyTorch module."""
    wsh, bc, w1p, b1p, w2p, b2p = packed
    n = x.shape[0]

    # ---- glue: 66-wide sliding windows from strided slices (no gather), bf16.
    # cols[b, m, h*W_POOL + p] = x[b, 0, h, 6p + m]   (matches torch flatten order)
    pad_w = POOL * (W_POOL - 1) + WIN - W_IN                        # = 1
    x2 = jnp.pad(x[:, 0, :, :], ((0, 0), (0, 0), (0, pad_w)))
    x2 = x2.astype(jnp.bfloat16)                                    # (N, H, W_IN+1)
    cols = jnp.stack(
        [x2[:, :, m:m + POOL * W_POOL:POOL] for m in range(WIN)], axis=1
    )                                                               # (N, WIN, H, W_POOL)
    cols = cols.reshape(n, WIN, FLAT)
    cols = jnp.pad(cols, ((0, 0), (0, 0), (0, FLAT_PAD - FLAT)))    # lane-align FLAT

    return pl.pallas_call(
        net_kernel,
        out_shape=jax.ShapeDtypeStruct((n, OUT), jnp.float32),
        grid_spec=pltpu.PrefetchScalarGridSpec(
            num_scalar_prefetch=0,
            grid=(NC,),
            in_specs=[
                pl.BlockSpec((n, WIN, FC), lambda i: (0, 0, i)),     # window chunk
                pl.BlockSpec((POOL, WIN), lambda i: (0, 0)),         # conv taps (resident)
                pl.BlockSpec(memory_space=pltpu.MemorySpace.SMEM),   # conv bias scalar
                pl.BlockSpec((FC, HID), lambda i: (i, 0)),           # dense1 weight chunk
                pl.BlockSpec((1, HID), lambda i: (0, 0)),            # dense1 bias
                pl.BlockSpec((HID, OUT), lambda i: (0, 0)),          # dense2 weight
                pl.BlockSpec((1, OUT), lambda i: (0, 0)),            # dense2 bias
            ],
            out_specs=pl.BlockSpec((n, OUT), lambda i: (0, 0)),
            scratch_shapes=[pltpu.VMEM((n, HID), jnp.float32),       # h_acc
                            pltpu.VMEM((n, FC), jnp.float32)],       # pooled staging
        ),
        compiler_params=pltpu.CompilerParams(
            dimension_semantics=("arbitrary",),      # FLAT axis is a K-reduction
            vmem_limit_bytes=16 * 1024 * 1024,
        ),
    )(cols, wsh, bc, w1p, b1p, w2p, b2p)


def net_reference(x, params):
    """Pure-JAX f32 reference mirroring the PyTorch forward literally."""
    wc, bc, w1, b1, w2, b2 = params
    x2 = x[:, 0]                                              # (N, H, W_IN)
    conv = sum(x2[:, :, k:k + W_CONV] * wc[k] for k in range(KW)) + bc
    conv = jnp.maximum(conv, 0.0)                             # relu(conv1)
    pooled = conv.reshape(x.shape[0], H, W_POOL, POOL).max(axis=-1)   # maxpool (1,6)/6
    flat = pooled.reshape(x.shape[0], FLAT)                   # view(-1, 1376)
    hdn = jnp.maximum(
        jnp.dot(flat, w1, precision=jax.lax.Precision.HIGHEST) + b1, 0.0)
    return jnp.dot(hdn, w2, precision=jax.lax.Precision.HIGHEST) + b2


def net_reference_bf16(x, params):
    """Reference that mirrors the kernel's bf16 operand rounding (f32 accumulate)."""
    wc, bc, w1, b1, w2, b2 = params
    rd = lambda a: a.astype(jnp.bfloat16).astype(jnp.float32)
    x2 = rd(x[:, 0])
    wcr = rd(wc)
    conv = sum(x2[:, :, k:k + W_CONV] * wcr[k] for k in range(KW))
    pooled = conv.reshape(x.shape[0], H, W_POOL, POOL).max(axis=-1)
    pooled = jnp.maximum(pooled + bc, 0.0)                    # bias after pool (== torch order)
    flat = rd(pooled.reshape(x.shape[0], FLAT))
    hdn = jnp.maximum(
        jnp.dot(flat, rd(w1), precision=jax.lax.Precision.HIGHEST) + b1, 0.0)
    return jnp.dot(hdn, w2, precision=jax.lax.Precision.HIGHEST) + b2


if __name__ == "__main__":
    key = jax.random.PRNGKey(0)
    ks = jax.random.split(key, 7)
    # deterministic synthetic parameters (shapes from the module's __init__)
    wc = jax.random.normal(ks[0], (KW,), jnp.float32) * 0.1         # conv1.weight squeezed
    bc = jax.random.normal(ks[1], (), jnp.float32) * 0.1            # conv1.bias
    w1 = jax.random.normal(ks[2], (FLAT, HID), jnp.float32) * 0.02  # dense_layer.weight.T
    b1 = jax.random.normal(ks[3], (HID,), jnp.float32) * 0.02
    w2 = jax.random.normal(ks[4], (HID, OUT), jnp.float32) * 0.05   # output.weight.T
    b2 = jax.random.normal(ks[5], (OUT,), jnp.float32) * 0.05
    params = (wc, bc, w1, b1, w2, b2)

    x = jax.random.normal(ks[6], (N, 1, H, W_IN), jnp.float32)

    packed = pack_params(params)          # one-time weight prep
    fwd = jax.jit(net_forward)
    out = jax.block_until_ready(fwd(x, packed))
    assert out.shape == (N, OUT), out.shape

    # tight check vs the reference that matches the kernel's bf16 operand rounding
    ref_bf16 = net_reference_bf16(x, params)
    assert jnp.allclose(out, ref_bf16, atol=5e-3, rtol=5e-3), (out, ref_bf16)
    # looser check vs full-f32 module semantics (bf16 weight/activation quantization)
    ref_f32 = net_reference(x, params)
    assert jnp.allclose(out, ref_f32, atol=1e-2, rtol=1e-2), (out, ref_f32)

    print("KERNEL_OK")
</pallas_src>

<mosaic_0001>
module attributes {stable_mosaic.version = 11 : i64} {
  func.func @net_kernel(%arg0: i32, %arg1: memref<2x66x768xbf16, #tpu.memory_space<vmem>>, %arg2: memref<6x66xbf16, #tpu.memory_space<vmem>>, %arg3: memref<1xf32, #tpu.memory_space<smem>>, %arg4: memref<768x173xbf16, #tpu.memory_space<vmem>>, %arg5: memref<1x173xf32, #tpu.memory_space<vmem>>, %arg6: memref<173x14xf32, #tpu.memory_space<vmem>>, %arg7: memref<1x14xf32, #tpu.memory_space<vmem>>, %arg8: memref<2x14xf32, #tpu.memory_space<vmem>>, %arg9: memref<2x173xf32, #tpu.memory_space<vmem>>, %arg10: memref<2x768xf32, #tpu.memory_space<vmem>>) attributes {dimension_semantics = [#tpu.dimension_semantics<arbitrary>], iteration_bounds = array<i64: 2>, scalar_prefetch = 0 : i64, scratch_operands = 2 : i64, tpu.core_type = #tpu.core_type<tc>, window_params = [{transform_indices = @transform_0, window_bounds = array<i64: 2, 66, 768>}, {pipeline_mode = #tpu.pipeline_mode<synchronous>, transform_indices = @transform_1, window_bounds = array<i64: 6, 66>}, {transform_indices = @transform_2, window_bounds = array<i64: 1>}, {transform_indices = @transform_3, window_bounds = array<i64: 768, 173>}, {pipeline_mode = #tpu.pipeline_mode<synchronous>, transform_indices = @transform_4, window_bounds = array<i64: 1, 173>}, {pipeline_mode = #tpu.pipeline_mode<synchronous>, transform_indices = @transform_5, window_bounds = array<i64: 173, 14>}, {pipeline_mode = #tpu.pipeline_mode<synchronous>, transform_indices = @transform_6, window_bounds = array<i64: 1, 14>}, {pipeline_mode = #tpu.pipeline_mode<synchronous>, transform_indices = @transform_7, window_bounds = array<i64: 2, 14>}]} {
    %c0_i32 = arith.constant 0 : i32
    %0 = arith.cmpi eq, %arg0, %c0_i32 : i32
    %1 = arith.extui %0 : i1 to i32
    %c0_i32_0 = arith.constant 0 : i32
    %2 = arith.cmpi ne, %1, %c0_i32_0 : i32
    scf.if %2 {
      %cst_26 = arith.constant 0.000000e+00 : f32
      %31 = vector.broadcast %cst_26 : f32 to vector<2x173xf32>
      %c0_27 = arith.constant 0 : index
      %c0_28 = arith.constant 0 : index
      %32 = vector.load %arg9[%c0_27, %c0_28] : memref<2x173xf32, #tpu.memory_space<vmem>>, vector<2x173xf32>
      tpu.vector_store %arg9[%c0_27, %c0_28], %31 {strides = array<i32>} : memref<2x173xf32, #tpu.memory_space<vmem>>, vector<2x173xf32>,
    } else {
    }
    %c0 = arith.constant 0 : index
    %c0_1 = arith.constant 0 : index
    %3 = vector.load %arg2[%c0, %c0_1] : memref<6x66xbf16, #tpu.memory_space<vmem>>, vector<6x66xbf16>
    %c0_2 = arith.constant 0 : index
    %c0_3 = arith.constant 0 : index
    %c0_4 = arith.constant 0 : index
    %4 = vector.load %arg1[%c0_2, %c0_3, %c0_4] : memref<2x66x768xbf16, #tpu.memory_space<vmem>>, vector<1x66x768xbf16>
    %5 = vector.shape_cast %4 : vector<1x66x768xbf16> to vector<66x768xbf16>
    %cst = arith.constant dense<0.000000e+00> : vector<6x768xf32>
    %6 = tpu.matmul %3, %5, %cst {dimension_numbers = #tpu.dot_dimension_numbers<[1], [0], [0], [1], [0, 0, 1, 1], [], []>} : vector<6x66xbf16>, vector<66x768xbf16>, vector<6x768xf32> -> vector<6x768xf32>
    %cst_5 = arith.constant dense<0xFF800000> : vector<768xf32>
    %7 = vector.multi_reduction <maximumf>, %6, %cst_5 [0] : vector<6x768xf32> to vector<768xf32>
    %8 = vector.shape_cast %7 : vector<768xf32> to vector<1x768xf32>
    %c0_6 = arith.constant 0 : index
    %c0_7 = arith.constant 0 : index
    %9 = vector.load %arg10[%c0_6, %c0_7] : memref<2x768xf32, #tpu.memory_space<vmem>>, vector<1x768xf32>
    tpu.vector_store %arg10[%c0_6, %c0_7], %8 {strides = array<i32>} : memref<2x768xf32, #tpu.memory_space<vmem>>, vector<1x768xf32>,
    %c1 = arith.constant 1 : index
    %c0_8 = arith.constant 0 : index
    %c0_9 = arith.constant 0 : index
    %10 = vector.load %arg1[%c1, %c0_8, %c0_9] : memref<2x66x768xbf16, #tpu.memory_space<vmem>>, vector<1x66x768xbf16>
    %11 = vector.shape_cast %10 : vector<1x66x768xbf16> to vector<66x768xbf16>
    %cst_10 = arith.constant dense<0.000000e+00> : vector<6x768xf32>
    %12 = tpu.matmul %3, %11, %cst_10 {dimension_numbers = #tpu.dot_dimension_numbers<[1], [0], [0], [1], [0, 0, 1, 1], [], []>} : vector<6x66xbf16>, vector<66x768xbf16>, vector<6x768xf32> -> vector<6x768xf32>
    %cst_11 = arith.constant dense<0xFF800000> : vector<768xf32>
    %13 = vector.multi_reduction <maximumf>, %12, %cst_11 [0] : vector<6x768xf32> to vector<768xf32>
    %14 = vector.shape_cast %13 : vector<768xf32> to vector<1x768xf32>
    %c1_12 = arith.constant 1 : index
    %c0_13 = arith.constant 0 : index
    %15 = vector.load %arg10[%c1_12, %c0_13] : memref<2x768xf32, #tpu.memory_space<vmem>>, vector<1x768xf32>
    tpu.vector_store %arg10[%c1_12, %c0_13], %14 {strides = array<i32>} : memref<2x768xf32, #tpu.memory_space<vmem>>, vector<1x768xf32>,
    %c0_14 = arith.constant 0 : index
    %c0_15 = arith.constant 0 : index
    %16 = vector.load %arg10[%c0_14, %c0_15] : memref<2x768xf32, #tpu.memory_space<vmem>>, vector<2x768xf32>
    %c0_16 = arith.constant 0 : index
    %17 = memref.load %arg3[%c0_16] : memref<1xf32, #tpu.memory_space<smem>>
    %18 = vector.broadcast %17 : f32 to vector<2x768xf32>
    %19 = arith.addf %16, %18 : vector<2x768xf32>
    %cst_17 = arith.constant 0.000000e+00 : f32
    %20 = vector.broadcast %cst_17 : f32 to vector<2x768xf32>
    %21 = arith.maximumf %19, %20 : vector<2x768xf32>
    %c0_18 = arith.constant 0 : index
    %c0_19 = arith.constant 0 : index
    %22 = vector.load %arg9[%c0_18, %c0_19] : memref<2x173xf32, #tpu.memory_space<vmem>>, vector<2x173xf32>
    %23 = arith.truncf %21 : vector<2x768xf32> to vector<2x768xbf16>
    %c0_20 = arith.constant 0 : index
    %c0_21 = arith.constant 0 : index
    %24 = vector.load %arg4[%c0_20, %c0_21] : memref<768x173xbf16, #tpu.memory_space<vmem>>, vector<768x173xbf16>
    %cst_22 = arith.constant dense<0.000000e+00> : vector<2x173xf32>
    %25 = tpu.matmul %23, %24, %cst_22 {dimension_numbers = #tpu.dot_dimension_numbers<[1], [0], [0], [1], [0, 0, 1, 1], [], []>} : vector<2x768xbf16>, vector<768x173xbf16>, vector<2x173xf32> -> vector<2x173xf32>
    %26 = arith.addf %22, %25 : vector<2x173xf32>
    %c0_23 = arith.constant 0 : index
    %c0_24 = arith.constant 0 : index
    %27 = vector.load %arg9[%c0_23, %c0_24] : memref<2x173xf32, #tpu.memory_space<vmem>>, vector<2x173xf32>
    tpu.vector_store %arg9[%c0_23, %c0_24], %26 {strides = array<i32>} : memref<2x173xf32, #tpu.memory_space<vmem>>, vector<2x173xf32>,
    %c1_i32 = arith.constant 1 : i32
    %28 = arith.cmpi eq, %arg0, %c1_i32 : i32
    %29 = arith.extui %28 : i1 to i32
    %c0_i32_25 = arith.constant 0 : i32
    %30 = arith.cmpi ne, %29, %c0_i32_25 : i32
    scf.if %30 {
      %c0_26 = arith.constant 0 : index
      %c0_27 = arith.constant 0 : index
      %31 = vector.load %arg9[%c0_26, %c0_27] : memref<2x173xf32, #tpu.memory_space<vmem>>, vector<2x173xf32>
      %c0_28 = arith.constant 0 : index
      %c0_29 = arith.constant 0 : index
      %32 = vector.load %arg5[%c0_28, %c0_29] : memref<1x173xf32, #tpu.memory_space<vmem>>, vector<1x173xf32>
      %33 = vector.broadcast %32 : vector<1x173xf32> to vector<2x173xf32>
      %34 = arith.addf %31, %33 : vector<2x173xf32>
      %cst_30 = arith.constant 0.000000e+00 : f32
      %35 = vector.broadcast %cst_30 : f32 to vector<2x173xf32>
      %36 = arith.maximumf %34, %35 : vector<2x173xf32>
      %c0_31 = arith.constant 0 : index
      %c0_32 = arith.constant 0 : index
      %37 = vector.load %arg6[%c0_31, %c0_32] : memref<173x14xf32, #tpu.memory_space<vmem>>, vector<173x14xf32>
      %cst_33 = arith.constant dense<0.000000e+00> : vector<2x14xf32>
      %38 = tpu.matmul %36, %37, %cst_33 {dimension_numbers = #tpu.dot_dimension_numbers<[1], [0], [0], [1], [0, 0, 1, 1], [], []>} : vector<2x173xf32>, vector<173x14xf32>, vector<2x14xf32> -> vector<2x14xf32>
      %c0_34 = arith.constant 0 : index
      %c0_35 = arith.constant 0 : index
      %39 = vector.load %arg7[%c0_34, %c0_35] : memref<1x14xf32, #tpu.memory_space<vmem>>, vector<1x14xf32>
      %40 = vector.broadcast %39 : vector<1x14xf32> to vector<2x14xf32>
      %41 = arith.addf %38, %40 : vector<2x14xf32>
      %c0_36 = arith.constant 0 : index
      %c0_37 = arith.constant 0 : index
      %42 = vector.load %arg8[%c0_36, %c0_37] : memref<2x14xf32, #tpu.memory_space<vmem>>, vector<2x14xf32>
      tpu.vector_store %arg8[%c0_36, %c0_37], %41 {strides = array<i32>} : memref<2x14xf32, #tpu.memory_space<vmem>>, vector<2x14xf32>,
    } else {
    }
    return
  }
  func.func @transform_0(%arg0: i32) -> (i32, i32, i32) {
    %c0_i32 = arith.constant 0 : i32
    %c0_i32_0 = arith.constant 0 : i32
    %c0_i32_1 = arith.constant 0 : i32
    return %c0_i32, %c0_i32_0, %arg0 : i32, i32, i32
  }
  func.func @transform_1(%arg0: i32) -> (i32, i32) {
    %c0_i32 = arith.constant 0 : i32
    %c0_i32_0 = arith.constant 0 : i32
    %c0_i32_1 = arith.constant 0 : i32
    return %c0_i32, %c0_i32_0 : i32, i32
  }
  func.func @transform_2(%arg0: i32) -> i32 {
    %c0_i32 = arith.constant 0 : i32
    %c0_i32_0 = arith.constant 0 : i32
    return %c0_i32 : i32
  }
  func.func @transform_3(%arg0: i32) -> (i32, i32) {
    %c0_i32 = arith.constant 0 : i32
    %c0_i32_0 = arith.constant 0 : i32
    return %arg0, %c0_i32 : i32, i32
  }
  func.func @transform_4(%arg0: i32) -> (i32, i32) {
    %c0_i32 = arith.constant 0 : i32
    %c0_i32_0 = arith.constant 0 : i32
    %c0_i32_1 = arith.constant 0 : i32
    return %c0_i32, %c0_i32_0 : i32, i32
  }
  func.func @transform_5(%arg0: i32) -> (i32, i32) {
    %c0_i32 = arith.constant 0 : i32
    %c0_i32_0 = arith.constant 0 : i32
    %c0_i32_1 = arith.constant 0 : i32
    return %c0_i32, %c0_i32_0 : i32, i32
  }
  func.func @transform_6(%arg0: i32) -> (i32, i32) {
    %c0_i32 = arith.constant 0 : i32
    %c0_i32_0 = arith.constant 0 : i32
    %c0_i32_1 = arith.constant 0 : i32
    return %c0_i32, %c0_i32_0 : i32, i32
  }
  func.func @transform_7(%arg0: i32) -> (i32, i32) {
    %c0_i32 = arith.constant 0 : i32
    %c0_i32_0 = arith.constant 0 : i32
    %c0_i32_1 = arith.constant 0 : i32
    return %c0_i32, %c0_i32_0 : i32, i32
  }
}

</mosaic_0001>

<bundles_post_ra>
// kernel: net_forward.1
= control target key start
LH: loop header
LB: loop body
LE: loop exit
PB: predicated region body
PF: predicated region fallthrough
CT: control target
= control target key end

     0   :  { %s3297_s0 = inlined_call_operand.vmem [shape: bf16[2,66,1536], index: 0, kind: input, shape index: {}]   ;;  %s3298_s1 = inlined_call_operand.vmem [shape: bf16[6,66], index: 1, kind: input, shape index: {}]   ;;  %s3299_s2 = inlined_call_operand.<no memory space> [shape: f32[1], index: 2, kind: input, shape index: {}]   ;;  %s3300_s3 = inlined_call_operand.vmem [shape: bf16[1536,173], index: 3, kind: input, shape index: {}]   ;;  %s3301_s4 = inlined_call_operand.vmem [shape: f32[1,173], index: 4, kind: input, shape index: {}]   ;;  %s3302_s5 = inlined_call_operand.vmem [shape: f32[173,14], index: 5, kind: input, shape index: {}]   ;;  %s3303_s6 = inlined_call_operand.vmem [shape: f32[1,14], index: 6, kind: input, shape index: {}]   ;;  %s3304_s7 = inlined_call_operand.hbm [shape: f32[2,14], index: 7, kind: output, shape index: {}]  }
   0x1   :  { %12 = sst [smem:[#allocation4]] %s3299_s2 }
   0x2   :  { %13 = vsyncpa [#allocation7], 0  ;;  %s2777_s26 = smov 0   ;;  %s2779_s27 = smov 0  }
   0x3   :  { %s2781_s28 = smov 0  }
   0x4 LB: > { %s2793_s2 = sadd.s32 4294967295, %s2726_s28   ;;  %s2796_s29 = sadd.s32 1, %s2726_s28   ;;  %s2726_s28 = sphi %s2781_s28, %s3309_s28   ;;  %s2722_s27 = sphi %s2779_s27, %s3308_s27   ;;  %s2718_s26 = sphi %s2777_s26, %s3307_s26  }
   0x5   : > { %s23_s30 = ssub.s32 %s2726_s28, %s2796_s29  ;;  %s26_s8 = sadd.s32 1, %s2722_s27 }
   0x6   : > { %p24_p0 = scmp.eq.s32.totalorder %s23_s30, 0  ;;  %p33_p1 = scmp.ne.s32.totalorder %s2722_s27, %s2718_s26 }
   0x7   : > { %p34_p2 = scmp.eq.s32.totalorder %s2726_s28, 0  ;;  %p2199_p4 = scmp.ge.s32.totalorder %s2726_s28, 2 }
   0x8   : > { %s2805_s9 = scalar_select %p24_p0, %s2722_s27, %s26_s8  }
   0x9   : > { %p35_p3 = por %p34_p2, %p33_p1  ;;  %226 = sbr.rel (%p2199_p4) target bundleno = 46 (0x2e), region = 36 }
   0xe   : > { %229 = sbr.rel (!%p35_p3) target bundleno = 46 (0x2e), region = 40  ;;  %s231_s10 = sand.u32 (%p35_p3), 1, %s2722_s27  }
   0xf   : > { %s2408_s11 = smul.u32 (%p35_p3), 24, %s2726_s28 }
  0x10   : > { %s2410_s12 = smul.u32 (%p35_p3), 432, %s231_s10 }
  0x11   : > { %s2813_s15 = scalar_lea.vmem (%p35_p3), %s3297_s0, %s2408_s11 }
  0x12   : > { %v249_v0 = vld [vmem:[%s2813_s15] sm:$0xff] (%p35_p3)  ;;  %v251_v1 = vld [vmem:[%s2813_s15 + $0x8] sm:$0xff] (%p35_p3)  ;;  %v253_v2 = vld [vmem:[%s2813_s15 + $0x10] sm:$0xff] (%p35_p3)  ;;  %s2818_s16 = scalar_lea.vmem (%p35_p3), [#allocation5], %s2410_s12 }
  0x13   : > { %250 = vst [vmem:[%s2818_s16] sm:$0xff] %v249_v0  ;;  %252 = vst [vmem:[%s2818_s16 + $0x8] sm:$0xff] %v251_v1  ;;  %v255_v3 = vld [vmem:[%s2813_s15 + $0x30] sm:$0xff]  ;;  %v257_v4 = vld [vmem:[%s2813_s15 + $0x38] sm:$0xff] }
  0x14   : > { %254 = vst [vmem:[%s2818_s16 + $0x10] sm:$0xff] %v253_v2  ;;  %v259_v5 = vld [vmem:[%s2813_s15 + $0x40] sm:$0xff]  ;;  %256 = vst [vmem:[%s2818_s16 + $0x18] sm:$0xff] %v255_v3  ;;  %v263_v7 = vld [vmem:[%s2813_s15 + $0x68] sm:$0xff] }
  0x15   : > { %258 = vst [vmem:[%s2818_s16 + $0x20] sm:$0xff] %v257_v4  ;;  %260 = vst [vmem:[%s2818_s16 + $0x28] sm:$0xff] %v259_v5  ;;  %v261_v6 = vld [vmem:[%s2813_s15 + $0x60] sm:$0xff]  ;;  %v265_v8 = vld [vmem:[%s2813_s15 + $0x70] sm:$0xff] }
  0x16   : > { %262 = vst [vmem:[%s2818_s16 + $0x30] sm:$0xff] %v261_v6  ;;  %264 = vst [vmem:[%s2818_s16 + $0x38] sm:$0xff] %v263_v7  ;;  %v267_v9 = vld [vmem:[%s2813_s15 + $0x90] sm:$0xff]  ;;  %v269_v10 = vld [vmem:[%s2813_s15 + $0x98] sm:$0xff] }
  0x17   : > { %266 = vst [vmem:[%s2818_s16 + $0x40] sm:$0xff] %v265_v8  ;;  %v271_v11 = vld [vmem:[%s2813_s15 + $0xa0] sm:$0xff]  ;;  %268 = vst [vmem:[%s2818_s16 + $0x48] sm:$0xff] %v267_v9  ;;  %v275_v13 = vld [vmem:[%s2813_s15 + $0xc8] sm:$0xff] }
  0x18   : > { %270 = vst [vmem:[%s2818_s16 + $0x50] sm:$0xff] %v269_v10  ;;  %272 = vst [vmem:[%s2818_s16 + $0x58] sm:$0xff] %v271_v11  ;;  %v273_v12 = vld [vmem:[%s2813_s15 + $0xc0] sm:$0xff]  ;;  %v277_v14 = vld [vmem:[%s2813_s15 + $0xd0] sm:$0xff] }
  0x19   : > { %274 = vst [vmem:[%s2818_s16 + $0x60] sm:$0xff] %v273_v12  ;;  %276 = vst [vmem:[%s2818_s16 + $0x68] sm:$0xff] %v275_v13  ;;  %v279_v15 = vld [vmem:[%s2813_s15 + $0xf0] sm:$0xff]  ;;  %v281_v16 = vld [vmem:[%s2813_s15 + $0xf8] sm:$0xff] }
  0x1a   : > { %278 = vst [vmem:[%s2818_s16 + $0x70] sm:$0xff] %v277_v14  ;;  %v283_v17 = vld [vmem:[%s2813_s15 + $0x100] sm:$0xff]  ;;  %280 = vst [vmem:[%s2818_s16 + $0x78] sm:$0xff] %v279_v15  ;;  %v287_v19 = vld [vmem:[%s2813_s15 + $0x128] sm:$0xff] }
  0x1b   : > { %282 = vst [vmem:[%s2818_s16 + $0x80] sm:$0xff] %v281_v16  ;;  %284 = vst [vmem:[%s2818_s16 + $0x88] sm:$0xff] %v283_v17  ;;  %v285_v18 = vld [vmem:[%s2813_s15 + $0x120] sm:$0xff]  ;;  %v289_v20 = vld [vmem:[%s2813_s15 + $0x130] sm:$0xff] }
  0x1c   : > { %286 = vst [vmem:[%s2818_s16 + $0x90] sm:$0xff] %v285_v18  ;;  %288 = vst [vmem:[%s2818_s16 + $0x98] sm:$0xff] %v287_v19  ;;  %v291_v21 = vld [vmem:[%s2813_s15 + $0x150] sm:$0xff]  ;;  %v293_v22 = vld [vmem:[%s2813_s15 + $0x158] sm:$0xff] }
  0x1d   : > { %290 = vst [vmem:[%s2818_s16 + $0xa0] sm:$0xff] %v289_v20  ;;  %v295_v23 = vld [vmem:[%s2813_s15 + $0x160] sm:$0xff]  ;;  %292 = vst [vmem:[%s2818_s16 + $0xa8] sm:$0xff] %v291_v21  ;;  %v299_v25 = vld [vmem:[%s2813_s15 + $0x188] sm:$0xff] }
  0x1e   : > { %294 = vst [vmem:[%s2818_s16 + $0xb0] sm:$0xff] %v293_v22  ;;  %296 = vst [vmem:[%s2818_s16 + $0xb8] sm:$0xff] %v295_v23  ;;  %v297_v24 = vld [vmem:[%s2813_s15 + $0x180] sm:$0xff]  ;;  %v301_v26 = vld [vmem:[%s2813_s15 + $0x190] sm:$0xff] }
  0x1f   : > { %298 = vst [vmem:[%s2818_s16 + $0xc0] sm:$0xff] %v297_v24  ;;  %300 = vst [vmem:[%s2818_s16 + $0xc8] sm:$0xff] %v299_v25  ;;  %v303_v27 = vld [vmem:[%s2813_s15 + $0x1b0] sm:$0xff]  ;;  %v305_v28 = vld [vmem:[%s2813_s15 + $0x1b8] sm:$0xff] }
  0x20   : > { %302 = vst [vmem:[%s2818_s16 + $0xd0] sm:$0xff] %v301_v26  ;;  %v307_v29 = vld [vmem:[%s2813_s15 + $0x1c0] sm:$0xff]  ;;  %304 = vst [vmem:[%s2818_s16 + $0xd8] sm:$0xff] %v303_v27  ;;  %v311_v31 = vld [vmem:[%s2813_s15 + $0x1e8] sm:$0xff] }
  0x21   : > { %306 = vst [vmem:[%s2818_s16 + $0xe0] sm:$0xff] %v305_v28  ;;  %308 = vst [vmem:[%s2818_s16 + $0xe8] sm:$0xff] %v307_v29  ;;  %v309_v30 = vld [vmem:[%s2813_s15 + $0x1e0] sm:$0xff]  ;;  %v313_v32 = vld [vmem:[%s2813_s15 + $0x1f0] sm:$0xff] }
  0x22   : > { %310 = vst [vmem:[%s2818_s16 + $0xf0] sm:$0xff] %v309_v30  ;;  %312 = vst [vmem:[%s2818_s16 + $0xf8] sm:$0xff] %v311_v31  ;;  %v315_v33 = vld [vmem:[%s2813_s15 + $0x210] sm:$0xff]  ;;  %v317_v34 = vld [vmem:[%s2813_s15 + $0x218] sm:$0xff] }
  0x23   : > { %314 = vst [vmem:[%s2818_s16 + $0x100] sm:$0xff] %v313_v32  ;;  %v319_v35 = vld [vmem:[%s2813_s15 + $0x220] sm:$0xff]  ;;  %316 = vst [vmem:[%s2818_s16 + $0x108] sm:$0xff] %v315_v33  ;;  %v323_v37 = vld [vmem:[%s2813_s15 + $0x248] sm:$0xff] }
  0x24   : > { %318 = vst [vmem:[%s2818_s16 + $0x110] sm:$0xff] %v317_v34  ;;  %320 = vst [vmem:[%s2818_s16 + $0x118] sm:$0xff] %v319_v35  ;;  %v321_v36 = vld [vmem:[%s2813_s15 + $0x240] sm:$0xff]  ;;  %v325_v38 = vld [vmem:[%s2813_s15 + $0x250] sm:$0xff] }
  0x25   : > { %322 = vst [vmem:[%s2818_s16 + $0x120] sm:$0xff] %v321_v36  ;;  %324 = vst [vmem:[%s2818_s16 + $0x128] sm:$0xff] %v323_v37  ;;  %v327_v39 = vld [vmem:[%s2813_s15 + $0x270] sm:$0xff]  ;;  %v329_v40 = vld [vmem:[%s2813_s15 + $0x278] sm:$0xff] }
  0x26   : > { %326 = vst [vmem:[%s2818_s16 + $0x130] sm:$0xff] %v325_v38  ;;  %v331_v41 = vld [vmem:[%s2813_s15 + $0x280] sm:$0xff]  ;;  %328 = vst [vmem:[%s2818_s16 + $0x138] sm:$0xff] %v327_v39  ;;  %v335_v43 = vld [vmem:[%s2813_s15 + $0x2a8] sm:$0xff] }
  0x27   : > { %330 = vst [vmem:[%s2818_s16 + $0x140] sm:$0xff] %v329_v40  ;;  %332 = vst [vmem:[%s2818_s16 + $0x148] sm:$0xff] %v331_v41  ;;  %v333_v42 = vld [vmem:[%s2813_s15 + $0x2a0] sm:$0xff]  ;;  %v337_v44 = vld [vmem:[%s2813_s15 + $0x2b0] sm:$0xff] }
  0x28   : > { %334 = vst [vmem:[%s2818_s16 + $0x150] sm:$0xff] %v333_v42  ;;  %336 = vst [vmem:[%s2818_s16 + $0x158] sm:$0xff] %v335_v43  ;;  %v339_v45 = vld [vmem:[%s2813_s15 + $0x2d0] sm:$0xff]  ;;  %v341_v46 = vld [vmem:[%s2813_s15 + $0x2d8] sm:$0xff] }
  0x29   : > { %338 = vst [vmem:[%s2818_s16 + $0x160] sm:$0xff] %v337_v44  ;;  %v343_v47 = vld [vmem:[%s2813_s15 + $0x2e0] sm:$0xff]  ;;  %340 = vst [vmem:[%s2818_s16 + $0x168] sm:$0xff] %v339_v45  ;;  %v347_v49 = vld [vmem:[%s2813_s15 + $0x308] sm:$0xff] }
  0x2a   : > { %342 = vst [vmem:[%s2818_s16 + $0x170] sm:$0xff] %v341_v46  ;;  %344 = vst [vmem:[%s2818_s16 + $0x178] sm:$0xff] %v343_v47  ;;  %v345_v48 = vld [vmem:[%s2813_s15 + $0x300] sm:$0xff]  ;;  %v349_v50 = vld [vmem:[%s2813_s15 + $0x310] sm:$0xff] }
  0x2b   : > { %346 = vst [vmem:[%s2818_s16 + $0x180] sm:$0xff] %v345_v48  ;;  %348 = vst [vmem:[%s2818_s16 + $0x188] sm:$0xff] %v347_v49  ;;  %v351_v51 = vld [vmem:[%s2813_s15 + $0x330] sm:$0xff]  ;;  %v353_v52 = vld [vmem:[%s2813_s15 + $0x338] sm:$0xff] }
  0x2c   : > { %350 = vst [vmem:[%s2818_s16 + $0x190] sm:$0xff] %v349_v50  ;;  %v355_v53 = vld [vmem:[%s2813_s15 + $0x340] sm:$0xff]  ;;  %352 = vst [vmem:[%s2818_s16 + $0x198] sm:$0xff] %v351_v51 }
  0x2d   : > { %354 = vst [vmem:[%s2818_s16 + $0x1a0] sm:$0xff] %v353_v52  ;;  %356 = vst [vmem:[%s2818_s16 + $0x1a8] sm:$0xff] %v355_v53 }
  0x2e PF: > { %p2201_p5 = scmp.ge.s32.totalorder %s2726_s28, 1  ;;  %p371_p6 = scmp.lt.s32.totalorder %s2726_s28, 3 }
  0x30   : > { %p372_p7 = pnand %p2201_p5, %p371_p6 }
  0x31   : > { %s378_s17 = sand.u32 (!%p372_p7), 1, %s2718_s26   ;;  %s411_s18 = smul.u32 (!%p372_p7), 96, %s2793_s2 }
  0x32   : > { %375 = sbr.rel (%p372_p7) target bundleno = 925 (0x39d), region = 67  ;;  %p2204_p9 = scmp.ne.s32.totalorder (!%p372_p7), %s2793_s2, 0 }
  0x33   : > { %s2411_s19 = smul.u32 (!%p372_p7), 432, %s378_s17  ;;  %p412_p8 = scmp.lt.s32.totalorder (!%p372_p7), %s411_s18, 191 }
  0x35   : > { %s2934_s24 = scalar_lea.vmem (!%p372_p7), [#allocation5], %s2411_s19 }
  0x37   : > { %s3311_s18 = smov (!%p412_p8, %s411_s18), 191  ;;  %422 = sbr.rel (%p2204_p9) target bundleno = 63 (0x3f), region = 75 }
  0x38   : > { %s2409_s20 = sshll.u32 %s3311_s18, 3 }
  0x39   : > { %s2932_s23 = scalar_lea.vmem %s3300_s3, %s2409_s20 }
  0x3c   : > { %vm423_vm0 = vcmask 1041408   ;;  %vm424_vm1 = vcmask 363522   ;;  %v2728_v54 = vmov 0.0  }
  0x3d   : > { %vm425_vm2 = vmor %vm424_vm1, %vm423_vm0 }
  0x3e   : > { %426 = vst.msk [vmem:[#allocation2] sm:$0xf] %vm425_vm2, %v2728_v54 }
  0x3f PF: > { %v452_v55 = vld [vmem:[%s2934_s24 + $0xc0] sm:$0x11]  ;;  %vm594_vm3 = vcmask 1040384   ;;  %v2450_v58 = vld [vmem:[%s2934_s24 + $0x94] ss:$24 sps:$4 sm:$0xff]   ;;  %v2729_v59 = vmov 0  }
  0x40   : > { %v2230_v56 = vcombine.high %v452_v55, %v452_v55  ;;  %v2229_v57 = vcombine.low %v452_v55, %v452_v55  ;;  %645 = vmatprep.mubr.bf16.mxu1 %v2729_v59  ;;  %1085 = vmatprep.mubr.bf16.mxu0 %v2729_v59  ;;  %v2452_v61 = vld [vmem:[%s2934_s24 + $0x90] ss:$24 sps:$4 sm:$0xff]   ;;  %v2453_v62 = vld [vmem:[%s2934_s24 + $0x64] ss:$24 sps:$4 sm:$0xff]   ;;  %v2455_v63 = vld [vmem:[%s2934_s24 + $0x60] ss:$24 sps:$4 sm:$0xff]  }
  0x41   : > { %v2456_v0 = vld [vmem:[%s2934_s24 + $0x34] ss:$24 sps:$4 sm:$0xff]   ;;  %v2458_v1 = vld [vmem:[%s2934_s24 + $0x30] ss:$24 sps:$4 sm:$0xff]   ;;  %v2459_v2 = vld [vmem:[%s2934_s24 + $0x4] ss:$24 sps:$4 sm:$0xff]  }
  0x42   : > { %2235 = vmatprep.subr.msk.bf16.mxu1 %vm594_vm3, %v2230_v56  ;;  %v596_v60 = vsel %vm594_vm3, %v2229_v57, 0  ;;  %v453_v3 = vld [vmem:[%s2934_s24 + $0xc8] sm:$0x11]  ;;  %v2461_v4 = vld [vmem:[%s2934_s24] ss:$24 sps:$4 sm:$0xff]   ;;  %vm590_vm4 = vcmask 539648  }
  0x43   : > { %620 = vmatpush1.bf16.msra.mxu1 %v596_v60  ;;  %v2232_v5 = vcombine.high %v453_v3, %v453_v3  ;;  %v2231_v6 = vcombine.low %v453_v3, %v453_v3  ;;  %v2266_v7 = vld [vmem:[%s2934_s24 + $0x1a0] sm:$0x11]  ;;  %v2466_v11 = vld [vmem:[%s2934_s24 + $0x9c] ss:$24 sps:$4 sm:$0xff]   ;;  %v2499_v15 = vld [vmem:[%s2934_s24 + $0x170] ss:$24 sps:$4 sm:$0xff]  }
  0x44   : > { %621 = vmatprep.subr.bf16.mxu1 %v2450_v58  ;;  %v2295_v8 = vcombine.high %v2266_v7, %v2266_v7  ;;  %v2294_v9 = vcombine.low %v2266_v7, %v2266_v7  ;;  %v2955_v10 = vld [vmem:[%s3298_s1] sm:$0x7]  ;;  %v2497_v13 = vld [vmem:[%s2934_s24 + $0x174] ss:$24 sps:$4 sm:$0xff]   ;;  %v2503_v16 = vld [vmem:[%s2934_s24 + $0x144] ss:$24 sps:$4 sm:$0xff]  }
  0x45   : > { %v602_v14 = vsel %vm594_vm3, %v2231_v6, 0  ;;  %v2464_v17 = vld [vmem:[%s2934_s24 + $0x98] ss:$24 sps:$4 sm:$0xff]   ;;  %v2469_v18 = vld [vmem:[%s2934_s24 + $0x6c] ss:$24 sps:$4 sm:$0xff]   ;;  %vm736_vm5 = vcmask 1045504  }
  0x46   : > { %2300 = vmatprep.subr.msk.bf16.mxu0 %vm594_vm3, %v2295_v8  ;;  %v1001_v12 = vsel %vm594_vm3, %v2294_v9, 0  ;;  %v2505_v19 = vld [vmem:[%s2934_s24 + $0x140] ss:$24 sps:$4 sm:$0xff]   ;;  %v2509_v20 = vld [vmem:[%s2934_s24 + $0x114] ss:$24 sps:$4 sm:$0xff]   ;;  %s1228_s28 = sld [smem:[#allocation4]] }
  0x47   : > { %622 = vmatpush1.bf16.msra.mxu1 %v2452_v61  ;;  %1060 = vmatpush1.bf16.msra.mxu0 %v1001_v12  ;;  %v2467_v21 = vld [vmem:[%s2934_s24 + $0x68] ss:$24 sps:$4 sm:$0xff]   ;;  %v2472_v22 = vld [vmem:[%s2934_s24 + $0x3c] ss:$24 sps:$4 sm:$0xff]   ;;  %v2470_v25 = vld [vmem:[%s2934_s24 + $0x38] ss:$24 sps:$4 sm:$0xff]  }
  0x48   : > { %623 = vmatprep.subr.bf16.mxu1 %v2453_v62  ;;  %1061 = vmatprep.subr.bf16.mxu0 %v2497_v13  ;;  %v2511_v23 = vld [vmem:[%s2934_s24 + $0x110] ss:$24 sps:$4 sm:$0xff]   ;;  %v2515_v24 = vld [vmem:[%s2934_s24 + $0xe4] ss:$24 sps:$4 sm:$0xff]   ;;  %v2517_v27 = vld [vmem:[%s2934_s24 + $0xe0] ss:$24 sps:$4 sm:$0xff]  }
  0x49   : > { %v2475_v26 = vld [vmem:[%s2934_s24 + $0xc] ss:$24 sps:$4 sm:$0xff]   ;;  %v2473_v28 = vld [vmem:[%s2934_s24 + $0x8] ss:$24 sps:$4 sm:$0xff]   ;;  %v454_v29 = vld [vmem:[%s2934_s24 + $0xd0] sm:$0x11] }
  0x4a   : > { %v2234_v30 = vcombine.high %v454_v29, %v454_v29  ;;  %v2233_v31 = vcombine.low %v454_v29, %v454_v29  ;;  %v2480_v32 = vld [vmem:[%s2934_s24 + $0xa4] ss:$24 sps:$4 sm:$0xff]   ;;  %v2478_v34 = vld [vmem:[%s2934_s24 + $0xa0] ss:$24 sps:$4 sm:$0xff]   ;;  %v2483_v35 = vld [vmem:[%s2934_s24 + $0x74] ss:$24 sps:$4 sm:$0xff]  }
  0x4b   : > { %624 = vmatpush1.bf16.msra.mxu1 %v2455_v63  ;;  %1062 = vmatpush1.bf16.msra.mxu0 %v2499_v15  ;;  %v2481_v36 = vld [vmem:[%s2934_s24 + $0x70] ss:$24 sps:$4 sm:$0xff]   ;;  %v2486_v37 = vld [vmem:[%s2934_s24 + $0x44] ss:$24 sps:$4 sm:$0xff]   ;;  %v2484_v38 = vld [vmem:[%s2934_s24 + $0x40] ss:$24 sps:$4 sm:$0xff]  }
  0x4c   : > { %625 = vmatprep.subr.bf16.mxu1 %v2456_v0  ;;  %1063 = vmatprep.subr.bf16.mxu0 %v2503_v16  ;;  %v608_v33 = vsel %vm594_vm3, %v2233_v31, 0  ;;  %v2489_v39 = vld [vmem:[%s2934_s24 + $0x14] ss:$24 sps:$4 sm:$0xff]   ;;  %v2265_v40 = vld [vmem:[%s2934_s24 + $0x198] sm:$0x11]  ;;  %vm1985_vm7 = vcmask 1041408  }
  0x4d   : > { %v2487_v41 = vld [vmem:[%s2934_s24 + $0x10] ss:$24 sps:$4 sm:$0xff]   ;;  %v2293_v42 = vcombine.high %v2265_v40, %v2265_v40  ;;  %v2292_v43 = vcombine.low %v2265_v40, %v2265_v40  ;;  %v2496_v44 = vld [vmem:[%s2934_s24 + $0x16c] ss:$24 sps:$4 sm:$0xff]   ;;  %v2502_v47 = vld [vmem:[%s2934_s24 + $0x13c] ss:$24 sps:$4 sm:$0xff]  }
  0x4e   : > { %v2494_v46 = vld [vmem:[%s2934_s24 + $0x168] ss:$24 sps:$4 sm:$0xff]   ;;  %v2500_v48 = vld [vmem:[%s2934_s24 + $0x138] ss:$24 sps:$4 sm:$0xff]   ;;  %v2508_v49 = vld [vmem:[%s2934_s24 + $0x10c] ss:$24 sps:$4 sm:$0xff]  }
  0x4f   : > { %626 = vmatpush1.bf16.msra.mxu1 %v2458_v1  ;;  %1064 = vmatpush1.bf16.msra.mxu0 %v2505_v19  ;;  %v995_v45 = vsel %vm594_vm3, %v2292_v43, 0  ;;  %v2506_v50 = vld [vmem:[%s2934_s24 + $0x108] ss:$24 sps:$4 sm:$0xff]   ;;  %v2514_v51 = vld [vmem:[%s2934_s24 + $0xdc] ss:$24 sps:$4 sm:$0xff]   ;;  %vm1986_vm8 = vcmask 363522  }
  0x50   : > { %627 = vmatprep.subr.bf16.mxu1 %v2459_v2  ;;  %1065 = vmatprep.subr.bf16.mxu0 %v2509_v20  ;;  %v2267_v52 = vld [vmem:[%s2934_s24 + $0x1a8] sm:$0x11]  ;;  %v2512_v53 = vld [vmem:[%s2934_s24 + $0xd8] ss:$24 sps:$4 sm:$0xff]   ;;  %v2522_v57 = vld [vmem:[%s2934_s24 + $0x17c] ss:$24 sps:$4 sm:$0xff]  }
  0x51   : > { %v2297_v54 = vcombine.high %v2267_v52, %v2267_v52  ;;  %v2296_v55 = vcombine.low %v2267_v52, %v2267_v52  ;;  %v2520_v58 = vld [vmem:[%s2934_s24 + $0x178] ss:$24 sps:$4 sm:$0xff]   ;;  %v2525_v60 = vld [vmem:[%s2934_s24 + $0x14c] ss:$24 sps:$4 sm:$0xff]   ;;  %v2523_v61 = vld [vmem:[%s2934_s24 + $0x148] ss:$24 sps:$4 sm:$0xff]  }
  0x52   : > { %v2528_v62 = vld [vmem:[%s2934_s24 + $0x11c] ss:$24 sps:$4 sm:$0xff]   ;;  %v2526_v63 = vld [vmem:[%s2934_s24 + $0x118] ss:$24 sps:$4 sm:$0xff]   ;;  %v2531_v0 = vld [vmem:[%s2934_s24 + $0xec] ss:$24 sps:$4 sm:$0xff]  }
  0x53   : > { %628 = vmatpush1.bf16.msra.mxu1 %v2461_v4  ;;  %1066 = vmatpush1.bf16.msra.mxu0 %v2511_v23  ;;  %v1007_v56 = vsel %vm594_vm3, %v2296_v55, 0  ;;  %v2529_v1 = vld [vmem:[%s2934_s24 + $0xe8] ss:$24 sps:$4 sm:$0xff]   ;;  %v2537_v3 = vld [vmem:[%s2932_s23 + $0x174] ss:$8 sps:$4 sm:$0xff]   ;;  %vm1987_vm9 = vmor %vm1986_vm8, %vm1985_vm7  ;;  %p2400_p10 = scmp.ne.s32.totalorder %s2793_s2, 1 }
  0x54   : > { %2237 = vmatprep.subr.msk.bf16.mxu1 %vm594_vm3, %v2232_v5  ;;  %1067 = vmatprep.subr.bf16.mxu0 %v2515_v24  ;;  %v2532_v2 = vld [vmem:[%s2932_s23 + $0x70] ss:$8 sps:$4 sm:$0xff]   ;;  %v2540_v5 = vld [vmem:[%s2932_s23 + $0x64] ss:$8 sps:$4 sm:$0xff]   ;;  %v2538_v6 = vld [vmem:[%s2932_s23 + $0x60] ss:$8 sps:$4 sm:$0xff]  }
  0x55   : > { %v2535_v4 = vld [vmem:[%s2932_s23 + $0x170] ss:$8 sps:$4 sm:$0xff]   ;;  %v2543_v7 = vld [vmem:[%s2932_s23 + $0x164] ss:$8 sps:$4 sm:$0xff]   ;;  %v2541_v8 = vld [vmem:[%s2932_s23 + $0x160] ss:$8 sps:$4 sm:$0xff]  }
  0x56   : > { %2236 = vmatmul.mubr.msk.bf16.vlgmr.msra.gmra.mxu1 %vm590_vm4, %v2955_v10  ;;  %v2546_v9 = vld [vmem:[%s2932_s23 + $0x54] ss:$8 sps:$4 sm:$0xff]   ;;  %v2547_v12 = vld [vmem:[%s2932_s23 + $0x150] ss:$8 sps:$4 sm:$0xff]   ;;  %v2552_v13 = vld [vmem:[%s2932_s23 + $0x44] ss:$8 sps:$4 sm:$0xff]  }
  0x57   : > { %661 = vmatpush1.bf16.msra.mxu1 %v602_v14  ;;  %686 = vmatprep.mubr.bf16.mxu1 %v2729_v59  ;;  %v2550_v14 = vld [vmem:[%s2932_s23 + $0x40] ss:$8 sps:$4 sm:$0xff]   ;;  %v2555_v15 = vld [vmem:[%s2932_s23 + $0x144] ss:$8 sps:$4 sm:$0xff]   ;;  %v2561_v19 = vld [vmem:[%s2932_s23 + $0x134] ss:$8 sps:$4 sm:$0xff]  }
  0x58   : > { %662 = vmatprep.subr.bf16.mxu1 %v2466_v11  ;;  %1068 = vmatpush1.bf16.msra.mxu0 %v2517_v27  ;;  %v2549_v11 = vld [vmem:[%s2932_s23 + $0x154] ss:$8 sps:$4 sm:$0xff]   ;;  %v2553_v16 = vld [vmem:[%s2932_s23 + $0x140] ss:$8 sps:$4 sm:$0xff]   ;;  %v2559_v20 = vld [vmem:[%s2932_s23 + $0x130] ss:$8 sps:$4 sm:$0xff]  }
  0x59   : > { %v2567_v23 = vld [vmem:[%s2932_s23 + $0x124] ss:$8 sps:$4 sm:$0xff]   ;;  %v2565_v24 = vld [vmem:[%s2932_s23 + $0x120] ss:$8 sps:$4 sm:$0xff]   ;;  %v2573_v27 = vld [vmem:[%s2932_s23 + $0x114] ss:$8 sps:$4 sm:$0xff]  }
  0x5a   : > { %v2576_v29 = vld [vmem:[%s2932_s23 + $0x4] ss:$8 sps:$4 sm:$0xff]   ;;  %v2589_v40 = vld [vmem:[%s2932_s23 + $0x1e0] ss:$8 sps:$4 sm:$0xff]   ;;  %v2597_v43 = vld [vmem:[%s2932_s23 + $0x1d4] ss:$8 sps:$4 sm:$0xff]  }
  0x5b   : > { %663 = vmatpush1.bf16.msra.mxu1 %v2464_v17  ;;  %2301 = vmatmul.mubr.msk.bf16.vlgmr.msra.gmra.mxu0 %vm590_vm4, %v2955_v10  ;;  %v2558_v17 = vld [vmem:[%s2932_s23 + $0x34] ss:$8 sps:$4 sm:$0xff]   ;;  %v2579_v31 = vld [vmem:[%s2932_s23 + $0x104] ss:$8 sps:$4 sm:$0xff]   ;;  %v2607_v52 = vld [vmem:[%s2932_s23 + $0x1b0] ss:$8 sps:$4 sm:$0xff]  }
  0x5c   : > { %664 = vmatprep.subr.bf16.mxu1 %v2469_v18  ;;  %v2556_v18 = vld [vmem:[%s2932_s23 + $0x30] ss:$8 sps:$4 sm:$0xff]   ;;  %v2615_v55 = vld [vmem:[%s2932_s23 + $0x1a4] ss:$8 sps:$4 sm:$0xff]  }
  0x5f   : > { %665 = vmatpush1.bf16.msra.mxu1 %v2467_v21  ;;  %v2564_v21 = vld [vmem:[%s2932_s23 + $0x24] ss:$8 sps:$4 sm:$0xff]  }
  0x60   : > { %666 = vmatprep.subr.bf16.mxu1 %v2472_v22  ;;  %v2562_v22 = vld [vmem:[%s2932_s23 + $0x20] ss:$8 sps:$4 sm:$0xff]  }
  0x63   : > { %667 = vmatpush1.bf16.msra.mxu1 %v2470_v25  ;;  %v2570_v25 = vld [vmem:[%s2932_s23 + $0x14] ss:$8 sps:$4 sm:$0xff]  }
  0x64   : > { %668 = vmatprep.subr.bf16.mxu1 %v2475_v26  ;;  %v2568_v26 = vld [vmem:[%s2932_s23 + $0x10] ss:$8 sps:$4 sm:$0xff]  }
  0x67   : > { %669 = vmatpush1.bf16.msra.mxu1 %v2473_v28  ;;  %v2571_v28 = vld [vmem:[%s2932_s23 + $0x110] ss:$8 sps:$4 sm:$0xff]  }
  0x68   : > { %2239 = vmatprep.subr.msk.bf16.mxu1 %vm594_vm3, %v2234_v30  ;;  %v2574_v30 = vld [vmem:[%s2932_s23] ss:$8 sps:$4 sm:$0xff]  }
  0x6a   : > { %2238 = vmatmul.mubr.msk.bf16.vlgmr.msra.gmra.mxu1 %vm590_vm4, %v2955_v10 }
  0x6b   : > { %702 = vmatpush1.bf16.msra.mxu1 %v608_v33  ;;  %727 = vmatprep.mubr.bf16.mxu1 %v2729_v59  ;;  %v2582_v33 = vld [vmem:[%s2932_s23 + $0xf4] ss:$8 sps:$4 sm:$0xff]  }
  0x6c   : > { %703 = vmatprep.subr.bf16.mxu1 %v2480_v32  ;;  %v2577_v32 = vld [vmem:[%s2932_s23 + $0x100] ss:$8 sps:$4 sm:$0xff]  }
  0x6f   : > { %704 = vmatpush1.bf16.msra.mxu1 %v2478_v34  ;;  %v2580_v34 = vld [vmem:[%s2932_s23 + $0xf0] ss:$8 sps:$4 sm:$0xff]  }
  0x70   : > { %705 = vmatprep.subr.bf16.mxu1 %v2483_v35  ;;  %v2585_v35 = vld [vmem:[%s2932_s23 + $0x1f4] ss:$8 sps:$4 sm:$0xff]  }
  0x73   : > { %706 = vmatpush1.bf16.msra.mxu1 %v2481_v36  ;;  %v2583_v36 = vld [vmem:[%s2932_s23 + $0x1f0] ss:$8 sps:$4 sm:$0xff]  }
  0x74   : > { %707 = vmatprep.subr.bf16.mxu1 %v2486_v37  ;;  %v2588_v37 = vld [vmem:[%s2932_s23 + $0xe4] ss:$8 sps:$4 sm:$0xff]  }
  0x77   : > { %708 = vmatpush1.bf16.msra.mxu1 %v2484_v38  ;;  %v2586_v38 = vld [vmem:[%s2932_s23 + $0xe0] ss:$8 sps:$4 sm:$0xff]  }
  0x78   : > { %709 = vmatprep.subr.bf16.mxu1 %v2489_v39  ;;  %v2591_v39 = vld [vmem:[%s2932_s23 + $0x1e4] ss:$8 sps:$4 sm:$0xff]  }
  0x7b   : > { %710 = vmatpush1.bf16.msra.mxu1 %v2487_v41  ;;  %v2594_v41 = vld [vmem:[%s2932_s23 + $0xd4] ss:$8 sps:$4 sm:$0xff]  }
  0x7c   : > { %2298 = vmatprep.subr.msk.bf16.mxu1 %vm594_vm3, %v2293_v42  ;;  %v2592_v42 = vld [vmem:[%s2932_s23 + $0xd0] ss:$8 sps:$4 sm:$0xff]  }
  0x7e   : > { %2240 = vmatmul.mubr.msk.bf16.vlgmr.msra.gmra.mxu1 %vm590_vm4, %v2955_v10 }
  0x7f   : > { %1019 = vmatpush1.bf16.msra.mxu1 %v995_v45  ;;  %1044 = vmatprep.mubr.bf16.mxu1 %v2729_v59  ;;  %v2600_v45 = vld [vmem:[%s2932_s23 + $0xc4] ss:$8 sps:$4 sm:$0xff]  }
  0x80   : > { %1020 = vmatprep.subr.bf16.mxu1 %v2496_v44  ;;  %v2595_v44 = vld [vmem:[%s2932_s23 + $0x1d0] ss:$8 sps:$4 sm:$0xff]  }
  0x83   : > { %1021 = vmatpush1.bf16.msra.mxu1 %v2494_v46  ;;  %v2598_v46 = vld [vmem:[%s2932_s23 + $0xc0] ss:$8 sps:$4 sm:$0xff]  }
  0x84   : > { %1022 = vmatprep.subr.bf16.mxu1 %v2502_v47  ;;  %v2603_v47 = vld [vmem:[%s2932_s23 + $0x1c4] ss:$8 sps:$4 sm:$0xff]  }
  0x87   : > { %1023 = vmatpush1.bf16.msra.mxu1 %v2500_v48  ;;  %v2601_v48 = vld [vmem:[%s2932_s23 + $0x1c0] ss:$8 sps:$4 sm:$0xff]  }
  0x88   : > { %1024 = vmatprep.subr.bf16.mxu1 %v2508_v49  ;;  %v2604_v49 = vld [vmem:[%s2932_s23 + $0xb0] ss:$8 sps:$4 sm:$0xff]  }
  0x8b   : > { %1025 = vmatpush1.bf16.msra.mxu1 %v2506_v50  ;;  %v2606_v50 = vld [vmem:[%s2932_s23 + $0xb4] ss:$8 sps:$4 sm:$0xff]  }
  0x8c   : > { %1026 = vmatprep.subr.bf16.mxu1 %v2514_v51  ;;  %v2609_v51 = vld [vmem:[%s2932_s23 + $0x1b4] ss:$8 sps:$4 sm:$0xff]  }
  0x8f   : > { %1027 = vmatpush1.bf16.msra.mxu1 %v2512_v53  ;;  %v2612_v53 = vld [vmem:[%s2932_s23 + $0xa4] ss:$8 sps:$4 sm:$0xff]  }
  0x90   : > { %2302 = vmatprep.subr.msk.bf16.mxu1 %vm594_vm3, %v2297_v54  ;;  %v2610_v54 = vld [vmem:[%s2932_s23 + $0xa0] ss:$8 sps:$4 sm:$0xff]  }
  0x92   : > { %2299 = vmatmul.mubr.msk.bf16.vlgmr.msra.gmra.mxu1 %vm590_vm4, %v2955_v10 }
  0x93   : > { %1101 = vmatpush1.bf16.msra.mxu1 %v1007_v56  ;;  %1126 = vmatprep.mubr.bf16.mxu1 %v2729_v59  ;;  %v2534_v59 = vld [vmem:[%s2932_s23 + $0x74] ss:$8 sps:$4 sm:$0xff]  }
  0x94   : > { %1102 = vmatprep.subr.bf16.mxu1 %v2522_v57  ;;  %1850 = vmatprep.subr.bf16.mxu0 %v2534_v59  ;;  %v2618_v56 = vld [vmem:[%s2932_s23 + $0x94] ss:$8 sps:$4 sm:$0xff]   ;;  %v2613_v57 = vld [vmem:[%s2932_s23 + $0x1a0] ss:$8 sps:$4 sm:$0xff]  }
  0x95   : > { %1851 = vmatpush1.bf16.msra.mxu0 %v2532_v2  ;;  %v2630_v59 = vld [vmem:[%s2932_s23 + $0x274] ss:$8 sps:$4 sm:$0xff]  }
  0x96   : > { %1852 = vmatprep.subr.bf16.mxu0 %v2540_v5 }
  0x97   : > { %1103 = vmatpush1.bf16.msra.mxu1 %v2520_v58  ;;  %v2616_v58 = vld [vmem:[%s2932_s23 + $0x90] ss:$8 sps:$4 sm:$0xff]  }
  0x98   : > { %1104 = vmatprep.subr.bf16.mxu1 %v2525_v60  ;;  %v2621_v60 = vld [vmem:[%s2932_s23 + $0x194] ss:$8 sps:$4 sm:$0xff]  }
  0x99   : > { %1853 = vmatpush1.bf16.msra.mxu0 %v2538_v6 }
  0x9a   : > { %1854 = vmatprep.subr.bf16.mxu0 %v2546_v9 }
  0x9b   : > { %1105 = vmatpush1.bf16.msra.mxu1 %v2523_v61  ;;  %v2624_v61 = vld [vmem:[%s2932_s23 + $0x84] ss:$8 sps:$4 sm:$0xff]  }
  0x9c   : > { %1106 = vmatprep.subr.bf16.mxu1 %v2528_v62  ;;  %v2619_v62 = vld [vmem:[%s2932_s23 + $0x190] ss:$8 sps:$4 sm:$0xff]  }
  0x9f   : > { %1107 = vmatpush1.bf16.msra.mxu1 %v2526_v63  ;;  %v2622_v63 = vld [vmem:[%s2932_s23 + $0x80] ss:$8 sps:$4 sm:$0xff]  }
  0xa0   : > { %1108 = vmatprep.subr.bf16.mxu1 %v2531_v0  ;;  %v2627_v0 = vld [vmem:[%s2932_s23 + $0x184] ss:$8 sps:$4 sm:$0xff]  }
  0xa3   : > { %1109 = vmatpush1.bf16.msra.mxu1 %v2529_v1  ;;  %v2625_v1 = vld [vmem:[%s2932_s23 + $0x180] ss:$8 sps:$4 sm:$0xff]  }
  0xa4   : > { %1891 = vmatprep.subr.bf16.mxu1 %v2537_v3 }
  0xa6   : > { %2303 = vmatmul.mubr.msk.bf16.vlgmr.msra.gmra.mxu1 %vm590_vm4, %v2955_v10  ;;  %v2544_v10 = vld [vmem:[%s2932_s23 + $0x50] ss:$8 sps:$4 sm:$0xff]  }
  0xa7   : > { %1892 = vmatpush1.bf16.msra.mxu1 %v2535_v4  ;;  %1855 = vmatpush1.bf16.msra.mxu0 %v2544_v10 }
  0xa8   : > { %1893 = vmatprep.subr.bf16.mxu1 %v2543_v7  ;;  %1856 = vmatprep.subr.bf16.mxu0 %v2552_v13 }
  0xab   : > { %1894 = vmatpush1.bf16.msra.mxu1 %v2541_v8  ;;  %1857 = vmatpush1.bf16.msra.mxu0 %v2550_v14 }
  0xac   : > { %1895 = vmatprep.subr.bf16.mxu1 %v2549_v11  ;;  %1858 = vmatprep.subr.bf16.mxu0 %v2558_v17 }
  0xaf   : > { %1896 = vmatpush1.bf16.msra.mxu1 %v2547_v12  ;;  %1859 = vmatpush1.bf16.msra.mxu0 %v2556_v18 }
  0xb0   : > { %1897 = vmatprep.subr.bf16.mxu1 %v2555_v15  ;;  %1860 = vmatprep.subr.bf16.mxu0 %v2564_v21 }
  0xb3   : > { %1898 = vmatpush1.bf16.msra.mxu1 %v2553_v16  ;;  %1861 = vmatpush1.bf16.msra.mxu0 %v2562_v22 }
  0xb4   : > { %1899 = vmatprep.subr.bf16.mxu1 %v2561_v19  ;;  %1862 = vmatprep.subr.bf16.mxu0 %v2570_v25 }
  0xb7   : > { %1900 = vmatpush1.bf16.msra.mxu1 %v2559_v20  ;;  %1863 = vmatpush1.bf16.msra.mxu0 %v2568_v26 }
  0xb8   : > { %1901 = vmatprep.subr.bf16.mxu1 %v2567_v23  ;;  %1864 = vmatprep.subr.bf16.mxu0 %v2576_v29 }
  0xbb   : > { %1902 = vmatpush1.bf16.msra.mxu1 %v2565_v24  ;;  %1865 = vmatpush1.bf16.msra.mxu0 %v2574_v30 }
  0xbc   : > { %1903 = vmatprep.subr.bf16.mxu1 %v2573_v27  ;;  %1866 = vmatprep.subr.bf16.mxu0 %v2582_v33 }
  0xbf   : > { %1904 = vmatpush1.bf16.msra.mxu1 %v2571_v28  ;;  %1867 = vmatpush2.bf16.msra.mxu0 %v2580_v34 }
  0xc0   : > { %1905 = vmatprep.subr.bf16.mxu1 %v2579_v31  ;;  %1868 = vmatprep.subr.bf16.mxu0 %v2588_v37 }
  0xc3   : > { %1906 = vmatpush1.bf16.msra.mxu1 %v2577_v32  ;;  %1869 = vmatpush2.bf16.msra.mxu0 %v2586_v38  ;;  %v791_v38 = vlaneseq }
  0xc4   : > { %1907 = vmatprep.subr.bf16.mxu1 %v2585_v35  ;;  %1870 = vmatprep.subr.bf16.mxu0 %v2594_v41 }
  0xc5   : > { %vm3113_vm6 = vcmp.lt.s32.totalorder %v791_v38, 768 }
  0xc7   : > { %1908 = vmatpush2.bf16.msra.mxu1 %v2583_v36  ;;  %1871 = vmatpush2.bf16.msra.mxu0 %v2592_v42  ;;  %v2730_v36 = vmov 1966171168  }
  0xc8   : > { %1909 = vmatprep.subr.bf16.mxu1 %v2591_v39  ;;  %1872 = vmatprep.subr.bf16.mxu0 %v2600_v45  ;;  %v789_v37 = vunpack.c.l.s4 %v2730_v36 }
  0xcb   : > { %1910 = vmatpush2.bf16.msra.mxu1 %v2589_v40  ;;  %1873 = vmatpush2.bf16.msra.mxu0 %v2598_v46 }
  0xcc   : > { %1911 = vmatprep.subr.bf16.mxu1 %v2597_v43  ;;  %1874 = vmatprep.subr.bf16.mxu0 %v2606_v50  ;;  %v790_v50 = vunpack.c.0.s8 %v789_v37 }
  0xcf   : > { %1912 = vmatpush2.bf16.msra.mxu1 %v2595_v44  ;;  %1875 = vmatpush2.bf16.msra.mxu0 %v2604_v49 }
  0xd0   : > { %1913 = vmatprep.subr.bf16.mxu1 %v2603_v47  ;;  %1876 = vmatprep.subr.bf16.mxu0 %v2612_v53 }
  0xd3   : > { %1914 = vmatpush2.bf16.msra.mxu1 %v2601_v48  ;;  %1877 = vmatpush2.bf16.msra.mxu0 %v2610_v54 }
  0xd4   : > { %1915 = vmatprep.subr.bf16.mxu1 %v2609_v51  ;;  %1878 = vmatprep.subr.bf16.mxu0 %v2618_v56  ;;  %v3101_v51 = vshrl.u32 %v791_v38, 7 }
  0xd7   : > { %1916 = vmatpush2.bf16.msra.mxu1 %v2607_v52  ;;  %1879 = vmatpush2.bf16.msra.mxu0 %v2616_v58 }
  0xd8   : > { %1917 = vmatprep.subr.bf16.mxu1 %v2615_v55  ;;  %1880 = vmatprep.subr.bf16.mxu0 %v2624_v61 }
  0xdb   : > { %1918 = vmatpush2.bf16.msra.mxu1 %v2613_v57  ;;  %1881 = vmatpush2.bf16.msra.mxu0 %v2622_v63  ;;  %v3104_v63 = vsub.s32 %v790_v50, %v3101_v51 }
  0xdc   : > { %1919 = vmatprep.subr.bf16.mxu1 %v2621_v60  ;;  %1932 = vmatprep.subr.bf16.mxu0 %v2630_v59 }
  0xdf   : > { %1920 = vmatpush2.bf16.msra.mxu1 %v2619_v62 }
  0xe0   : > { %1921 = vmatprep.subr.bf16.mxu1 %v2627_v0 }
  0xe3   : > { %1922 = vmatpush2.bf16.msra.mxu1 %v2625_v1 }
 0x116   : > { %v647_v2 = vpop.f32.mrf.mxu1 }
 0x117   : > { %v737_v17 = vsel %vm736_vm5, %v647_v2, -inf }
 0x118   : > { %v649_v3 = vpop.f32.mrf.mxu1  ;;  %v738_v21 = vrot.slane %v737_v17, 4 }
 0x119   : > { %v744_v11 = vsel %vm736_vm5, %v649_v3, -inf }
 0x11a   : > { %v651_v4 = vpop.f32.mrf.mxu1  ;;  %v745_v18 = vrot.slane %v744_v11, 4  ;;  %v739_v25 = vmax.f32 %v737_v17, %v738_v21 }
 0x11b   : > { %v3091_v6 = vpop.f32.mrf.mxu0 }
 0x11c   : > { %v652_v5 = vpop.f32.mrf.mxu1  ;;  %v746_v23 = vmax.f32 %v744_v11, %v745_v18  ;;  %v740_v29 = vrot.slane %v739_v25, 2 }
 0x11d   : > { %v3093_v7 = vpop.f32.mrf.mxu0 }
 0x11e   : > { %v747_v27 = vrot.slane %v746_v23, 2  ;;  %v741_v33 = vmax.f32 %v739_v25, %v740_v29 }
 0x11f   : > { %v1091_v9 = vpop.f32.mrf.mxu0 }
 0x120   : > { %v748_v31 = vmax.f32 %v746_v23, %v747_v27  ;;  %v742_v45 = vrot.slane %v741_v33, 1 }
 0x121   : > { %v1092_v14 = vpop.f32.mrf.mxu0 }
 0x122   : > { %v749_v40 = vrot.slane %v748_v31, 1  ;;  %v743_v57 = vmax.f32 %v741_v33, %v742_v45  ;;  %v1149_v14 = vsel %vm736_vm5, %v3091_v6, -inf }
 0x124   : > { %v750_v52 = vmax.f32 %v748_v31, %v749_v40 }
 0x126   : > { %v785_v62 = vcombine.low %v743_v57, %v750_v52 }
 0x128   : > { %v794_v3 = vrot.slane %v785_v62, %v3104_v63 }
 0x12a   : > { %v688_v8 = vpop.f32.mrf.mxu1 }
 0x12b   : > { %v751_v12 = vsel %vm736_vm5, %v688_v8, -inf }
 0x12c   : > { %v690_v10 = vpop.f32.mrf.mxu1  ;;  %v752_v19 = vrot.slane %v751_v12, 4 }
 0x12d   : > { %v758_v13 = vsel %vm736_vm5, %v690_v10, -inf }
 0x12e   : > { %v759_v15 = vrot.slane %v758_v13, 4  ;;  %v692_v16 = vpop.f32.mrf.mxu1  ;;  %v753_v24 = vmax.f32 %v751_v12, %v752_v19 }
 0x12f   : > { %v1156_v16 = vsel %vm736_vm5, %v3093_v7, -inf }
 0x130   : > { %v693_v20 = vpop.f32.mrf.mxu1  ;;  %v760_v22 = vmax.f32 %v758_v13, %v759_v15  ;;  %v754_v28 = vrot.slane %v753_v24, 2  ;;  %v1157_v23 = vrot.slane %v1156_v16, 4 }
 0x131   : > { %v1150_v20 = vrot.slane %v1149_v14, 4 }
 0x132   : > { %v761_v26 = vrot.slane %v760_v22, 2  ;;  %v755_v32 = vmax.f32 %v753_v24, %v754_v28  ;;  %v1158_v28 = vmax.f32 %v1156_v16, %v1157_v23 }
 0x134   : > { %v762_v30 = vmax.f32 %v760_v22, %v761_v26  ;;  %v756_v41 = vrot.slane %v755_v32, 1  ;;  %v1151_v26 = vmax.f32 %v1149_v14, %v1150_v20  ;;  %v1159_v31 = vrot.slane %v1158_v28, 2 }
 0x136   : > { %v763_v34 = vrot.slane %v762_v30, 1  ;;  %v757_v53 = vmax.f32 %v755_v32, %v756_v41  ;;  %v1152_v7 = vrot.slane %v1151_v26, 2 }
 0x138   : > { %v764_v46 = vmax.f32 %v762_v30, %v763_v34  ;;  %v1153_v33 = vmax.f32 %v1151_v26, %v1152_v7 }
 0x13a   : > { %v786_v58 = vcombine.low %v757_v53, %v764_v46  ;;  %v1154_v37 = vrot.slane %v1153_v33, 1 }
 0x13c   : > { %v801_v59 = vrot.slane %v786_v58, %v3104_v63  ;;  %v1155_v45 = vmax.f32 %v1153_v33, %v1154_v37  ;;  %v2634_v37 = vld [vmem:[%s2932_s23 + $0x250] ss:$8 sps:$4 sm:$0xff]  }
 0x13e   : > { %v729_v35 = vpop.f32.mrf.mxu1  ;;  %v809_v8 = vcombine.low %v794_v3, %v801_v59 }
 0x13f   : > { %v765_v39 = vsel %vm736_vm5, %v729_v35, -inf  ;;  %v1160_v35 = vmax.f32 %v1158_v28, %v1159_v31 }
 0x140   : > { %v766_v42 = vrot.slane %v765_v39, 4  ;;  %v731_v43 = vpop.f32.mrf.mxu1  ;;  %v816_v11 = vrot.slane %v809_v8, %v3104_v63 }
 0x141   : > { %v772_v44 = vsel %vm736_vm5, %v731_v43, -inf }
 0x142   : > { %v767_v47 = vmax.f32 %v765_v39, %v766_v42  ;;  %v773_v48 = vrot.slane %v772_v44, 4  ;;  %v733_v49 = vpop.f32.mrf.mxu1  ;;  %v1161_v39 = vrot.slane %v1160_v35, 1 }
 0x144   : > { %v768_v54 = vrot.slane %v767_v47, 2  ;;  %v774_v55 = vmax.f32 %v772_v44, %v773_v48  ;;  %v734_v56 = vpop.f32.mrf.mxu1  ;;  %v1162_v48 = vmax.f32 %v1160_v35, %v1161_v39  ;;  %v2631_v35 = vld [vmem:[%s2932_s23 + $0x260] ss:$8 sps:$4 sm:$0xff]  }
 0x145   : > { %v2637_v39 = vld [vmem:[%s2932_s23 + $0x240] ss:$8 sps:$4 sm:$0xff]  }
 0x146   : > { %v769_v60 = vmax.f32 %v767_v47, %v768_v54  ;;  %v775_v61 = vrot.slane %v774_v55, 2  ;;  %v1184_v58 = vcombine.low %v1155_v45, %v1162_v48  ;;  %v2646_v45 = vld [vmem:[%s2932_s23 + $0x210] ss:$8 sps:$4 sm:$0xff]   ;;  %v2654_v48 = vld [vmem:[%s2932_s23 + $0x2f4] ss:$8 sps:$4 sm:$0xff]  }
 0x148   : > { %v770_v0 = vrot.slane %v769_v60, 1  ;;  %v776_v1 = vmax.f32 %v774_v55, %v775_v61  ;;  %v1199_v59 = vrot.slane %v1184_v58, %v3104_v63  ;;  %v2664_v58 = vld [vmem:[%s2932_s23 + $0x2b0] ss:$8 sps:$4 sm:$0xff]  }
 0x14a   : > { %v777_v2 = vrot.slane %v776_v1, 1  ;;  %v771_v4 = vmax.f32 %v769_v60, %v770_v0 }
 0x14c   : > { %v778_v5 = vmax.f32 %v776_v1, %v777_v2 }
 0x14e   : > { %v787_v9 = vcombine.low %v771_v4, %v778_v5 }
 0x150   : > { %v808_v10 = vrot.slane %v787_v9, %v3104_v63 }
 0x152   : > { %v823_v12 = vrot.slane %v808_v10, %v3104_v63  ;;  %v1046_v13 = vpop.f32.mrf.mxu1 }
 0x153   : > { %v1135_v19 = vsel %vm736_vm5, %v1046_v13, -inf  ;;  %v2731_v13 = vmov 1983009808  }
 0x154   : > { %v824_v17 = vcombine.low %v816_v11, %v823_v12  ;;  %v1048_v18 = vpop.f32.mrf.mxu1  ;;  %v1136_v24 = vrot.slane %v1135_v19, 4  ;;  %v1239_v14 = vunpack.c.l.s4 %v2731_v13 }
 0x155   : > { %v1142_v21 = vsel %vm736_vm5, %v1048_v18, -inf }
 0x156   : > { %830 = vst.msk [vmem:[#allocation3] ss:$2 sm:$0x3f] %vm3113_vm6, %v824_v17  ;;  %v1143_v22 = vrot.slane %v1142_v21, 4  ;;  %v1050_v6 = vpop.f32.mrf.mxu1  ;;  %v1137_v29 = vmax.f32 %v1135_v19, %v1136_v24  ;;  %v1240_v16 = vunpack.c.0.s8 %v1239_v14  ;;  %v1229_v17 = vstv %s1228_s28 }
 0x158   : > { %v1051_v25 = vpop.f32.mrf.mxu1  ;;  %v1144_v27 = vmax.f32 %v1142_v21, %v1143_v22  ;;  %v1138_v32 = vrot.slane %v1137_v29, 2  ;;  %v3133_v21 = vsub.s32 %v1240_v16, %v3101_v51 }
 0x15a   : > { %v1145_v30 = vrot.slane %v1144_v27, 2  ;;  %v1139_v36 = vmax.f32 %v1137_v29, %v1138_v32  ;;  %v2628_v29 = vld [vmem:[%s2932_s23 + $0x270] ss:$8 sps:$4 sm:$0xff]   ;;  %v2633_v32 = vld [vmem:[%s2932_s23 + $0x264] ss:$8 sps:$4 sm:$0xff]  }
 0x15c   : > { %v1146_v34 = vmax.f32 %v1144_v27, %v1145_v30  ;;  %v1140_v42 = vrot.slane %v1139_v36, 1 }
 0x15e   : > { %v1147_v38 = vrot.slane %v1146_v34, 1  ;;  %v1141_v53 = vmax.f32 %v1139_v36, %v1140_v42  ;;  %v2636_v36 = vld [vmem:[%s2932_s23 + $0x254] ss:$8 sps:$4 sm:$0xff]   ;;  %v2645_v42 = vld [vmem:[%s2932_s23 + $0x224] ss:$8 sps:$4 sm:$0xff]  }
 0x160   : > { %v1148_v47 = vmax.f32 %v1146_v34, %v1147_v38  ;;  %v2639_v38 = vld [vmem:[%s2932_s23 + $0x244] ss:$8 sps:$4 sm:$0xff]  }
 0x162   : > { %v1183_v57 = vcombine.low %v1141_v53, %v1148_v47  ;;  %v2649_v47 = vld [vmem:[%s2932_s23 + $0x200] ss:$8 sps:$4 sm:$0xff]   ;;  %v2660_v53 = vld [vmem:[%s2932_s23 + $0x2d4] ss:$8 sps:$4 sm:$0xff]  }
 0x164   : > { %v1192_v1 = vrot.slane %v1183_v57, %v3104_v63  ;;  %v2666_v57 = vld [vmem:[%s2932_s23 + $0x2b4] ss:$8 sps:$4 sm:$0xff]  }
 0x166   : > { %v1128_v40 = vpop.f32.mrf.mxu1  ;;  %v1207_v5 = vcombine.low %v1192_v1, %v1199_v59  ;;  %v2675_v1 = vld [vmem:[%s2932_s23 + $0x284] ss:$8 sps:$4 sm:$0xff]   ;;  %v2673_v59 = vld [vmem:[%s2932_s23 + $0x280] ss:$8 sps:$4 sm:$0xff]  }
 0x167   : > { %v1163_v41 = vsel %vm736_vm5, %v1128_v40, -inf  ;;  %v2642_v40 = vld [vmem:[%s2932_s23 + $0x234] ss:$8 sps:$4 sm:$0xff]  }
 0x168   : > { %v1164_v43 = vrot.slane %v1163_v41, 4  ;;  %v1130_v44 = vpop.f32.mrf.mxu1  ;;  %v1214_v10 = vrot.slane %v1207_v5, %v3104_v63 }
 0x169   : > { %v1170_v46 = vsel %vm736_vm5, %v1130_v44, -inf  ;;  %v2648_v44 = vld [vmem:[%s2932_s23 + $0x214] ss:$8 sps:$4 sm:$0xff]  }
 0x16a   : > { %v1165_v49 = vmax.f32 %v1163_v41, %v1164_v43  ;;  %v1171_v50 = vrot.slane %v1170_v46, 4  ;;  %v1132_v52 = vpop.f32.mrf.mxu1  ;;  %v2640_v41 = vld [vmem:[%s2932_s23 + $0x230] ss:$8 sps:$4 sm:$0xff]   ;;  %v2643_v43 = vld [vmem:[%s2932_s23 + $0x220] ss:$8 sps:$4 sm:$0xff]  }
 0x16b   : > { %v2655_v52 = vld [vmem:[%s2932_s23 + $0x2e0] ss:$8 sps:$4 sm:$0xff]  }
 0x16c   : > { %v1166_v54 = vrot.slane %v1165_v49, 2  ;;  %v1172_v55 = vmax.f32 %v1170_v46, %v1171_v50  ;;  %v1133_v56 = vpop.f32.mrf.mxu1  ;;  %v2651_v46 = vld [vmem:[%s2932_s23 + $0x204] ss:$8 sps:$4 sm:$0xff]  }
 0x16d   : > { %v2657_v50 = vld [vmem:[%s2932_s23 + $0x2e4] ss:$8 sps:$4 sm:$0xff]   ;;  %v2661_v56 = vld [vmem:[%s2932_s23 + $0x2c0] ss:$8 sps:$4 sm:$0xff]  }
 0x16e   : > { %v1167_v60 = vmax.f32 %v1165_v49, %v1166_v54  ;;  %v1173_v61 = vrot.slane %v1172_v55, 2  ;;  %v2652_v49 = vld [vmem:[%s2932_s23 + $0x2f0] ss:$8 sps:$4 sm:$0xff]  }
 0x16f   : > { %v2658_v54 = vld [vmem:[%s2932_s23 + $0x2d0] ss:$8 sps:$4 sm:$0xff]  }
 0x170   : > { %v1168_v62 = vrot.slane %v1167_v60, 1  ;;  %v1174_v0 = vmax.f32 %v1172_v55, %v1173_v61  ;;  %v2663_v55 = vld [vmem:[%s2932_s23 + $0x2c4] ss:$8 sps:$4 sm:$0xff]   ;;  %v2667_v61 = vld [vmem:[%s2932_s23 + $0x2a0] ss:$8 sps:$4 sm:$0xff]  }
 0x172   : > { %v1175_v2 = vrot.slane %v1174_v0, 1  ;;  %v1169_v3 = vmax.f32 %v1167_v60, %v1168_v62  ;;  %v2669_v60 = vld [vmem:[%s2932_s23 + $0x2a4] ss:$8 sps:$4 sm:$0xff]   ;;  %v2672_v62 = vld [vmem:[%s2932_s23 + $0x294] ss:$8 sps:$4 sm:$0xff]  }
 0x174   : > { %v1176_v4 = vmax.f32 %v1174_v0, %v1175_v2  ;;  %v2670_v0 = vld [vmem:[%s2932_s23 + $0x290] ss:$8 sps:$4 sm:$0xff]  }
 0x176   : > { %v1185_v8 = vcombine.low %v1169_v3, %v1176_v4 }
 0x178   : > { %v1206_v9 = vrot.slane %v1185_v8, %v3104_v63 }
 0x17a   : > { %v1221_v11 = vrot.slane %v1206_v9, %v3104_v63 }
 0x17c   : > { %v1222_v12 = vcombine.low %v1214_v10, %v1221_v11 }
 0x17e   : > { %1225 = vst.msk [vmem:[#allocation3 + $0x1] ss:$2 sm:$0x3f] %vm3113_vm6, %v1222_v12 }
 0x185   : > { %v1226_v18 = vld [vmem:[#allocation3] sm:$0xff]  ;;  %v1227_v19 = vld [vmem:[#allocation3 + $0x8] sm:$0xf] }
 0x186   : > { %v1230_v20 = vadd.f32 %v1229_v17, %v1226_v18  ;;  %v1231_v22 = vadd.f32 %v1229_v17, %v1227_v19 }
 0x188   : > { %v1232_v23 = vmax.f32 %v1230_v20, 0.0  ;;  %v1233_v63 = vmax.f32 %v1231_v22, 0.0 }
 0x18a   : > { %v1244_v6 = vrot.slane %v1232_v23, %v3133_v21  ;;  %v1237_v24 = vcombine.high %v1232_v23, %v1232_v23  ;;  %v3137_v15 = vrot.slane %v1233_v63, %v3133_v21  ;;  %v1234_v23 = vld [vmem:[#allocation2] sm:$0xf] }
 0x18c   : > { %v1252_v25 = vcombine.high %v1244_v6, %v1244_v6  ;;  %v1251_v26 = vrot.slane %v1237_v24, %v3133_v21  ;;  %v1261_v27 = vcombine.high %v3137_v15, %v3137_v15  ;;  %v1268_v30 = vpack.c.bf16 %v1244_v6, %v1244_v6 }
 0x18d   : > { %v1272_v2 = vpack.c.bf16 %v3137_v15, %v3137_v15 }
 0x18e   : > { %v1269_v28 = vpack.c.bf16 %v1252_v25, %v1252_v25  ;;  %v1253_v7 = vcombine.high %v1251_v26, %v1251_v26  ;;  %v1273_v33 = vpack.c.bf16 %v1261_v27, %v1261_v27  ;;  %v1270_v34 = vpack.c.bf16 %v1251_v26, %v1251_v26 }
 0x190   : > { %1882 = vmatprep.mubr.bf16.mxu0 %v1269_v28  ;;  %v1271_v31 = vpack.c.bf16 %v1253_v7, %v1253_v7 }
 0x191   : > { %1883 = vmatmul.mubr.bf16.vlgmr.msra.gmra.mxu0 %v1268_v30 }
 0x192   : > { %1933 = vmatpush1.bf16.msra.mxu0 %v2628_v29  ;;  %1923 = vmatprep.mubr.bf16.mxu1 %v1271_v31 }
 0x193   : > { %1964 = vmatprep.mubr.bf16.mxu0 %v1273_v33  ;;  %1924 = vmatmul.mubr.bf16.vlgmr.msra.gmra.mxu1 %v1270_v34 }
 0x194   : > { %1934 = vmatprep.subr.bf16.mxu0 %v2633_v32 }
 0x196   : > { %1935 = vmatpush1.bf16.msra.mxu0 %v2631_v35 }
 0x197   : > { %1936 = vmatprep.subr.bf16.mxu0 %v2636_v36 }
 0x19a   : > { %1937 = vmatpush1.bf16.msra.mxu0 %v2634_v37 }
 0x19b   : > { %1938 = vmatprep.subr.bf16.mxu0 %v2639_v38 }
 0x19e   : > { %1939 = vmatpush1.bf16.msra.mxu0 %v2637_v39 }
 0x19f   : > { %1940 = vmatprep.subr.bf16.mxu0 %v2642_v40 }
 0x1a2   : > { %1941 = vmatpush1.bf16.msra.mxu0 %v2640_v41 }
 0x1a3   : > { %1942 = vmatprep.subr.bf16.mxu0 %v2645_v42 }
 0x1a6   : > { %1943 = vmatpush1.bf16.msra.mxu0 %v2643_v43 }
 0x1a7   : > { %1944 = vmatprep.subr.bf16.mxu0 %v2648_v44 }
 0x1aa   : > { %1945 = vmatpush1.bf16.msra.mxu0 %v2646_v45 }
 0x1ab   : > { %1946 = vmatprep.subr.bf16.mxu0 %v2651_v46 }
 0x1ae   : > { %1947 = vmatpush1.bf16.msra.mxu0 %v2649_v47 }
 0x1af   : > { %1948 = vmatprep.subr.bf16.mxu0 %v2654_v48 }
 0x1b2   : > { %1949 = vmatpush2.bf16.msra.mxu0 %v2652_v49 }
 0x1b3   : > { %1950 = vmatprep.subr.bf16.mxu0 %v2657_v50 }
 0x1b6   : > { %1951 = vmatpush2.bf16.msra.mxu0 %v2655_v52 }
 0x1b7   : > { %1952 = vmatprep.subr.bf16.mxu0 %v2660_v53 }
 0x1ba   : > { %1953 = vmatpush2.bf16.msra.mxu0 %v2658_v54 }
 0x1bb   : > { %1954 = vmatprep.subr.bf16.mxu0 %v2663_v55 }
 0x1be   : > { %1955 = vmatpush2.bf16.msra.mxu0 %v2661_v56 }
 0x1bf   : > { %1956 = vmatprep.subr.bf16.mxu0 %v2666_v57 }
 0x1c2   : > { %1957 = vmatpush2.bf16.msra.mxu0 %v2664_v58 }
 0x1c3   : > { %1958 = vmatprep.subr.bf16.mxu0 %v2669_v60 }
 0x1c6   : > { %1959 = vmatpush2.bf16.msra.mxu0 %v2667_v61 }
 0x1c7   : > { %1960 = vmatprep.subr.bf16.mxu0 %v2672_v62 }
 0x1ca   : > { %1961 = vmatpush2.bf16.msra.mxu0 %v2670_v0 }
 0x1cb   : > { %1962 = vmatprep.subr.bf16.mxu0 %v2675_v1 }
 0x1ce   : > { %1963 = vmatpush2.bf16.msra.mxu0 %v2673_v59 }
 0x1d1   : > { %1965 = vmatmul.mubr.bf16.vlgmr.msra.gmra.mxu0 %v1272_v2 }
 0x251   : > { %v1884_v3 = vpop.f32.mrf.mxu0 }
 0x253   : > { %v1886_v4 = vpop.f32.mrf.mxu0  ;;  %v1925_v5 = vpop.f32.mrf.mxu1 }
 0x254   : > { %v1926_v14 = vadd.f32 %v1925_v5, %v1884_v3 }
 0x255   : > { %v1888_v8 = vpop.f32.mrf.mxu0  ;;  %v1927_v9 = vpop.f32.mrf.mxu1 }
 0x256   : > { %v1928_v16 = vadd.f32 %v1927_v9, %v1886_v4 }
 0x257   : > { %v1889_v10 = vpop.f32.mrf.mxu0  ;;  %v1929_v11 = vpop.f32.mrf.mxu1 }
 0x259   : > { %v1930_v12 = vpop.f32.mrf.mxu1 }
 0x291   : > { %v1966_v13 = vpop.f32.mrf.mxu0 }
 0x292   : > { %v1967_v18 = vadd.f32 %v1966_v13, %v1926_v14 }
 0x293   : > { %v1968_v17 = vpop.f32.mrf.mxu0 }
 0x294   : > { %v1969_v19 = vadd.f32 %v1968_v17, %v1928_v16 }
 0x295   : > { %v1970_v20 = vpop.f32.mrf.mxu0 }
 0x296   : > { %v1975_v22 = vcombine.low %v1967_v18, %v1969_v19 }
 0x297   : > { %v1971_v63 = vpop.f32.mrf.mxu0 }
 0x298   : > { %v1982_v6 = vrot.slane %v1975_v22, %v3133_v21  ;;  %1992 = sbr.rel (%p2400_p10) target bundleno = 910 (0x38e), region = 79 }
 0x29a   : > { %v1984_v24 = vadd.f32 %v1982_v6, %v1234_v23 }
 0x29c   : > { %1988 = vst.msk [vmem:[#allocation2] sm:$0xf] %vm1987_vm9, %v1984_v24 }
 0x29d   : > { %v2030_v15 = vld [vmem:[%s3302_s5 + $0x78] sm:$0xff]  ;;  %v2732_v25 = vmov 0.0   ;;  %v2029_v26 = vld [vmem:[%s3302_s5 + $0x70] sm:$0xff]  ;;  %v2028_v27 = vld [vmem:[%s3302_s5 + $0x68] sm:$0xff]  ;;  %v1998_v28 = vsub.s32 0, %v3101_v51  ;;  %v2002_v29 = vsub.s32 1, %v3101_v51 }
 0x29e   : > { %2061 = vmatprep.subr.mxu0 %v2732_v25  ;;  %v2027_v7 = vld [vmem:[%s3302_s5 + $0x60] sm:$0xff]  ;;  %v2026_v30 = vld [vmem:[%s3302_s5 + $0x58] sm:$0xff]  ;;  %v2025_v33 = vld [vmem:[%s3302_s5 + $0x50] sm:$0xff]  ;;  %vm2054_vm10 = vcmask 367616   ;;  %vm2057_vm11 = vcmask 1044480   ;;  %vm2131_vm12 = vcmask 107520  }
 0x29f   : > { %2062 = vmatpush1.msra.mxu0 %v2030_v15  ;;  %v1994_v31 = vld [vmem:[%s3301_s4] sm:$0x3]  ;;  %v2024_v35 = vld [vmem:[%s3302_s5 + $0x48] sm:$0xff]  ;;  %v2022_v40 = vld [vmem:[%s3302_s5 + $0x38] sm:$0xff] }
 0x2a0   : > { %2063 = vmatprep.subr.mxu0 %v2732_v25  ;;  %v1999_v32 = vrot.slane %v1994_v31, %v1998_v28  ;;  %v2003_v51 = vrot.slane %v1994_v31, %v2002_v29  ;;  %v2023_v38 = vld [vmem:[%s3302_s5 + $0x40] sm:$0xff]  ;;  %v2021_v42 = vld [vmem:[%s3302_s5 + $0x30] sm:$0xff]  ;;  %v2020_v44 = vld [vmem:[%s3302_s5 + $0x28] sm:$0xff] }
 0x2a1   : > { %2064 = vmatpush1.msra.mxu0 %v2029_v26  ;;  %v2019_v46 = vld [vmem:[%s3302_s5 + $0x20] sm:$0xff]  ;;  %v2017_v47 = vld [vmem:[%s3302_s5 + $0x10] sm:$0xff]  ;;  %v2016_v48 = vld [vmem:[%s3302_s5 + $0x8] sm:$0xff] }
 0x2a2   : > { %2065 = vmatprep.subr.mxu0 %v2732_v25  ;;  %v2004_v34 = vcombine.low %v1999_v32, %v2003_v51  ;;  %v2015_v49 = vld [vmem:[%s3302_s5] sm:$0xff]  ;;  %v2036_v50 = vld [vmem:[%s3302_s5 + $0xa8] sm:$0x1f]  ;;  %v2034_v53 = vld [vmem:[%s3302_s5 + $0x98] sm:$0xff] }
 0x2a3   : > { %2066 = vmatpush1.msra.mxu0 %v2028_v27  ;;  %v1993_v36 = vld [vmem:[#allocation2] sm:$0xf]  ;;  %v2033_v54 = vld [vmem:[%s3302_s5 + $0x90] sm:$0xff]  ;;  %v2032_v55 = vld [vmem:[%s3302_s5 + $0x88] sm:$0xff] }
 0x2a4   : > { %2067 = vmatprep.subr.mxu0 %v2732_v25  ;;  %v2011_v37 = vrot.slane %v2004_v34, %v3133_v21  ;;  %v2035_v52 = vld [vmem:[%s3302_s5 + $0xa0] sm:$0xff] }
 0x2a5   : > { %2068 = vmatpush1.msra.mxu0 %v2027_v7  ;;  %v2031_v56 = vld [vmem:[%s3302_s5 + $0x80] sm:$0xff] }
 0x2a6   : > { %2069 = vmatprep.subr.mxu0 %v2732_v25  ;;  %v2013_v39 = vadd.f32 %v2011_v37, %v1993_v36  ;;  %v2401_v57 = vld [vmem:[%s3303_s6] ss:$0 sm:$0xff] }
 0x2a7   : > { %2070 = vmatpush1.msra.mxu0 %v2026_v30 }
 0x2a8   : > { %2071 = vmatprep.subr.mxu0 %v2732_v25  ;;  %v2014_v41 = vmax.f32 %v2013_v39, 0.0 }
 0x2a9   : > { %2072 = vmatpush1.msra.mxu0 %v2025_v33 }
 0x2aa   : > { %2073 = vmatprep.subr.mxu0 %v2732_v25  ;;  %v2051_v43 = vrot.slane %v2014_v41, %v3133_v21  ;;  %v2018_v21 = vld [vmem:[%s3302_s5 + $0x18] sm:$0xff] }
 0x2ab   : > { %2074 = vmatpush1.msra.mxu0 %v2024_v35 }
 0x2ac   : > { %2075 = vmatprep.subr.mxu0 %v2732_v25  ;;  %v2052_v45 = vcombine.high %v2051_v43, %v2051_v43 }
 0x2ad   : > { %2076 = vmatpush1.msra.mxu0 %v2023_v38 }
 0x2ae   : > { %2077 = vmatprep.subr.mxu0 %v2732_v25  ;;  %2403 = vmatprep.mubr.msk.f32.mxu0 %vm2054_vm10, %v2052_v45 }
 0x2af   : > { %2078 = vmatpush1.msra.mxu0 %v2022_v40 }
 0x2b0   : > { %2079 = vmatprep.subr.mxu0 %v2732_v25 }
 0x2b1   : > { %2080 = vmatpush1.msra.mxu0 %v2021_v42 }
 0x2b2   : > { %2081 = vmatprep.subr.mxu0 %v2732_v25 }
 0x2b3   : > { %2082 = vmatpush1.msra.mxu0 %v2020_v44 }
 0x2b4   : > { %2083 = vmatprep.subr.mxu0 %v2732_v25 }
 0x2b5   : > { %2084 = vmatpush1.msra.mxu0 %v2019_v46 }
 0x2b6   : > { %2085 = vmatprep.subr.mxu0 %v2732_v25 }
 0x2b7   : > { %2086 = vmatpush1.msra.mxu0 %v2018_v21 }
 0x2b8   : > { %2087 = vmatprep.subr.mxu0 %v2732_v25 }
 0x2b9   : > { %2088 = vmatpush1.msra.mxu0 %v2017_v47 }
 0x2ba   : > { %2089 = vmatprep.subr.mxu0 %v2732_v25 }
 0x2bb   : > { %2090 = vmatpush1.msra.mxu0 %v2016_v48 }
 0x2bc   : > { %2091 = vmatprep.subr.mxu0 %v2732_v25 }
 0x2bd   : > { %2092 = vmatpush1.msra.mxu0 %v2015_v49 }
 0x2be   : > { %2113 = vmatprep.subr.mxu0 %v2732_v25 }
 0x2bf   : > { %2402 = vmatpush2.msk.msra.mxu0 %vm2057_vm11, %v2036_v50 }
 0x2c0   : > { %2115 = vmatprep.subr.mxu0 %v2732_v25 }
 0x2c1   : > { %2116 = vmatpush2.msra.mxu0 %v2035_v52 }
 0x2c2   : > { %2117 = vmatprep.subr.mxu0 %v2732_v25 }
 0x2c3   : > { %2118 = vmatpush2.msra.mxu0 %v2034_v53 }
 0x2c4   : > { %2119 = vmatprep.subr.mxu0 %v2732_v25 }
 0x2c5   : > { %2120 = vmatpush2.msra.mxu0 %v2033_v54 }
 0x2c6   : > { %2121 = vmatprep.subr.mxu0 %v2732_v25 }
 0x2c7   : > { %2122 = vmatpush2.msra.mxu0 %v2032_v55 }
 0x2c8   : > { %2123 = vmatprep.subr.mxu0 %v2732_v25 }
 0x2c9   : > { %2124 = vmatpush2.msra.mxu0 %v2031_v56 }
 0x2ca   : > { %2126 = vmatmul.mubr.f32.vlgmr.msra.gmra.mxu0 %v2051_v43 }
 0x38a   : > { %v2127_v58 = vpop.f32.mrf.mxu0 }
 0x38b   : > { %v2128_v60 = vadd.f32 %v2401_v57, %v2127_v58 }
 0x38c   : > { %v2129_v61 = vpop.f32.mrf.mxu0 }
 0x38d   : > { %2132 = vst.msk [vmem:[#allocation6] sm:$0x3] %vm2131_vm12, %v2128_v60 }
 0x38e PF: > { %p2416_p11 = scmp.eq.s32.totalorder %s2793_s2, 1  ;;  %s2733_s16 = smov [#allocation6]  }
 0x38f   : > { %s2140_s17 = sshll.u32 %s2733_s16, 4  ;;  %s2141_s17 = int_to_ptr.vmem [resolvable:$true] %s2140_s17 }
 0x390   : > { %s2676_s18 = scalar_lea.vmem %s2141_s17, 32  ;;  %p2683_p1 = scmp.lt.s32.totalorder %s2141_s17, %s2141_s17 }
 0x391   : > { %p2677_p12 = scmp.ne.s32.totalorder %s2141_s17, %s2676_s18  ;;  %p2684_p2 = scmp.lt.s32.totalorder %s2676_s18, %s2676_s18 }
 0x393   : > { %p2678_p13 = pnand %p2677_p12, %p2416_p11  ;;  %p2685_p3 = por %p2684_p2, %p2683_p1 }
 0x395   : > { %p2679_p0 = pneg %p2678_p13 }
 0x397   : > { %p2686_p4 = pnand %p2685_p3, %p2679_p0 }
 0x399   : > { %2689 = shalt.err (!%p2686_p4)
}
 0x39a   : > { %2413 = dma.vmem_to_hbm [thread:$0]  (%p2416_p11), %s2141_s17, 32, %s3304_s7, [#allocation7]  }
 0x39b   : > { %2713 = dma.done.wait (%p2416_p11), [#allocation7], 32  }
 0x39c   : > { %2715 = vsyncadd (%p2416_p11), [#allocation7], 4294967264 }
 0x39d PF: > { %p16_p5 = scmp.ge.s32.totalorder %s2796_s29, 4   ;;  %s3307_s26 = smov %s2722_s27 }
 0x39e   : > { %s3308_s27 = smov %s2805_s9  ;;  %s3309_s28 = smov %s2796_s29 }
 0x39f   :  { %18 = sbr.rel (!%p16_p5) target bundleno = 4 (0x4), region = 116 }
 0x3a4   :  { %2153 = vsyncpa [#allocation7], 1 }
 0x3a5   :  { %2155 = vsyncpa [#allocation7 + $0x1], 1 }

</bundles_post_ra>
